<compile_context>
chip_gen: v7x
topology: tpu7x:2x2x1
jax: 0.10.0
libtpu: 0.0.40
codegen_flags: <defaults>
</compile_context>

<pallas_src>
import jax
import jax.numpy as jnp
import numpy as np
from jax.experimental import pallas as pl
from jax.experimental.pallas import tpu as pltpu

N = 16      # number of points
C_IN = 8    # in_channels
C_OUT = 32  # out_channels
HID = 64    # hidden width of pos_nn / attn_nn (fixed by the module definition)

# Packed parameter slab layout (row offsets are multiples of 8 -> sublane-aligned slices).
_R_W_IN, _R_W_CAT, _R_WP1, _R_WP2, _R_WA1, _R_WA2, _R_W_OUT = 0, 8, 16, 24, 88, 120, 184
_W_ROWS = 216        # 216 = 27 sublane tiles
_LANES = 128


# ----------------------------------------------------------------------------
# Single fused kernel (one grid step per graph):
#   lin_in+ReLU -> fused (dst|value|src) projection -> batched pos_nn / attn_nn over all
#   N*N (target, source) pairs -> masked channel-wise softmax over sources -> weighted
#   aggregation -> lin_out+ReLU.
# ----------------------------------------------------------------------------
def _fused_block_kernel(x_ref, rel_ref, mask_ref, sel_ref, w_ref, b_ref, y_ref):
    n = x_ref.shape[0]            # nodes (targets == sources)
    c = y_ref.shape[1]            # C_OUT
    hid = HID
    pairs = n * n

    # ---- carve packed parameters (static, sublane-aligned slices) -----------
    w_in = w_ref[_R_W_IN:_R_W_IN + C_IN, 0:C_IN]            # (C_IN, C_IN)
    w_cat = w_ref[_R_W_CAT:_R_W_CAT + C_IN, 0:3 * c]         # (C_IN, 3*C_OUT) [dst|v|src]
    wp1 = w_ref[_R_WP1:_R_WP1 + 3, 0:hid]                    # (3, HID)
    wp2 = w_ref[_R_WP2:_R_WP2 + hid, 0:c]                    # (HID, C_OUT)
    wa1 = w_ref[_R_WA1:_R_WA1 + c, 0:hid]                    # (C_OUT, HID)
    wa2 = w_ref[_R_WA2:_R_WA2 + hid, 0:c]                    # (HID, C_OUT)
    w_out = w_ref[_R_W_OUT:_R_W_OUT + c, 0:c]                # (C_OUT, C_OUT)
    b_in = b_ref[0:1, 0:C_IN]
    bp1 = b_ref[1:2, 0:hid]
    bp2 = b_ref[2:3, 0:c]
    ba1 = b_ref[3:4, 0:hid]
    ba2 = b_ref[4:5, 0:c]
    b_out = b_ref[5:6, 0:c]

    # ---- lin_in + ReLU (one MXU push) ---------------------------------------
    h = jnp.maximum(
        jnp.dot(x_ref[...], w_in, preferred_element_type=jnp.float32) + b_in, 0.0)  # (n, C_IN)

    # ---- fused lin_dst / lin / lin_src projections (one MXU push) -----------
    proj = jnp.dot(h, w_cat, preferred_element_type=jnp.float32)   # (n, 3C)
    adst = proj[:, 0:c]             # lin_dst(x')_i  (lane offset 0 -> feeds next matmul)
    xv = proj[:, c:2 * c]           # lin(x')_j      value features
    asrc = proj[:, 2 * c:3 * c]     # lin_src(x')_j

    # ---- expand per-target rows to all (target, source) pairs on the MXU ----
    # sel[i*n + j, i] = 1  ->  row i*n+j of (sel @ A) is A[i]  (target-major pair order).
    adst_p = jnp.dot(sel_ref[...], adst, preferred_element_type=jnp.float32)   # (P, C)

    # ---- pos_nn on all pairs: layer 1 is a single K=3 MXU matmul ------------
    # rel_ref is pre-flattened (P, 3) with rel[i*n+j] = pos_i - pos_j (wrapper glue).
    d1 = jnp.maximum(
        jnp.dot(rel_ref[...], wp1, preferred_element_type=jnp.float32) + bp1, 0.0)   # (P, HID)
    delta = jnp.maximum(
        jnp.dot(d1, wp2, preferred_element_type=jnp.float32) + bp2, 0.0)             # (P, C)
    delta3 = delta.reshape(n, n, c)                                                  # (tgt, src, C)

    # ---- attn_nn on all pairs at once (two big matmuls) ---------------------
    ap = (adst_p.reshape(n, n, c) - asrc[None, :, :] + delta3).reshape(pairs, c)
    e1 = jnp.maximum(
        jnp.dot(ap, wa1, preferred_element_type=jnp.float32) + ba1, 0.0)              # (P, HID)
    e = jnp.maximum(
        jnp.dot(e1, wa2, preferred_element_type=jnp.float32) + ba2, 0.0)              # (P, C)

    # ---- masked channel-wise softmax over sources + weighted aggregation ----
    # mask_ref: additive mask per pair, pre-broadcast to (P, C): 0 where edge j->i
    # (incl. self loop), -1e30 elsewhere -> masked exp underflows to exactly 0.
    logits = (e + mask_ref[...]).reshape(n, n, c)                   # (tgt, src, C)
    m = jnp.max(logits, axis=1, keepdims=True)                      # (tgt, 1, C)
    pexp = jnp.exp(logits - m)                                      # masked entries -> 0
    v3 = xv[None, :, :] + delta3                                    # (tgt, src, C)
    # fuse numerator + denominator into ONE cross-sublane reduction (lane concat is free).
    both = jnp.concatenate([pexp * v3, pexp], axis=-1)              # (tgt, src, 2C)
    s = jnp.sum(both, axis=1)                                       # (tgt, 2C)
    num = s[:, 0:c]
    den = s[:, c:2 * c]
    # exact reciprocal keeps the 1e-4 reference check; approx=True would move it to the EUP.
    out = num * pl.reciprocal(den, approx=False)                    # (tgt, C)

    # ---- lin_out + ReLU, single full-tile store ------------------------------
    y_ref[...] = jnp.maximum(
        jnp.dot(out, w_out, preferred_element_type=jnp.float32) + b_out, 0.0)


# ----------------------------------------------------------------------------
# Wrapper glue: pack parameters into 2 slabs, densify edge_index, launch pallas_call.
# ----------------------------------------------------------------------------
def pack_params(p):
    """Pack 13 weight/bias tensors into one (216,128) weight slab + one (8,128) bias slab."""
    def put(slab, arr, r, c0=0):
        return slab.at[r:r + arr.shape[0], c0:c0 + arr.shape[1]].set(arr)

    # [w_dst | w_v | w_src] so the slice feeding the next MXU matmul sits at lane offset 0.
    w_cat = jnp.concatenate([p["w_dst"], p["w_v"], p["w_src"]], axis=1)   # (C_IN, 3*C_OUT)

    W = jnp.zeros((_W_ROWS, _LANES), jnp.float32)
    W = put(W, p["w_in"], _R_W_IN)
    W = put(W, w_cat, _R_W_CAT)
    W = put(W, p["wp1"], _R_WP1)
    W = put(W, p["wp2"], _R_WP2)
    W = put(W, p["wa1"], _R_WA1)
    W = put(W, p["wa2"], _R_WA2)
    W = put(W, p["w_out"], _R_W_OUT)

    B = jnp.zeros((8, _LANES), jnp.float32)
    B = put(B, p["b_in"], 0)
    B = put(B, p["bp1"], 1)
    B = put(B, p["bp2"], 2)
    B = put(B, p["ba1"], 3)
    B = put(B, p["ba2"], 4)
    B = put(B, p["b_out"], 5)
    return W, B


def _graph_glue(pos, edge_index, n):
    """Densify edge_index into an additive softmax mask (pre-broadcast, lane-dense) and
    the flattened pairwise relative positions (target-major)."""
    src, dst = edge_index[0], edge_index[1]
    eye = jnp.eye(n, dtype=jnp.float32)
    # adj[i, j] = 1 iff there is an edge j -> i ; remove then add self-loops (PyG default).
    adj = jnp.zeros((n, n), jnp.float32).at[dst, src].set(1.0)
    adj = adj * (1.0 - eye) + eye
    # Additive mask, target-major (row = i*n + j), pre-broadcast to C_OUT lanes.
    mask = jnp.broadcast_to(((adj - 1.0) * 1e30).reshape(n * n, 1), (n * n, C_OUT))
    # rel[i*n + j] = pos_i - pos_j (target minus source), matching PyG's message().
    rel = (pos[:, None, :] - pos[None, :, :]).reshape(n * n, 3)
    return rel, mask


def _batched_call(x_b, rel_b, mask_b, sel, w_slab, b_slab):
    bsz, n, c_in = x_b.shape
    pairs = n * n
    in_specs = [
        pl.BlockSpec((None, n, c_in), lambda b: (b, 0, 0)),        # x       (per-graph)
        pl.BlockSpec((None, pairs, 3), lambda b: (b, 0, 0)),       # rel     (per-graph)
        pl.BlockSpec((None, pairs, C_OUT), lambda b: (b, 0, 0)),   # mask    (per-graph)
        pl.BlockSpec(sel.shape, lambda b: (0, 0)),                 # sel     (VMEM-resident)
        pl.BlockSpec(w_slab.shape, lambda b: (0, 0)),              # weights (VMEM-resident)
        pl.BlockSpec(b_slab.shape, lambda b: (0, 0)),              # biases  (VMEM-resident)
    ]
    out_specs = pl.BlockSpec((None, n, C_OUT), lambda b: (b, 0, 0))
    return pl.pallas_call(
        _fused_block_kernel,
        out_shape=jax.ShapeDtypeStruct((bsz, n, C_OUT), jnp.float32),
        grid=(bsz,),
        in_specs=in_specs,
        out_specs=out_specs,
        compiler_params=pltpu.CompilerParams(dimension_semantics=("parallel",)),
    )(x_b, rel_b, mask_b, sel, w_slab, b_slab)


def transformer_block_batched(x_b, pos_b, edge_index_list, p):
    """Batch of graphs (same N), one grid step per graph; weights fetched once."""
    bsz, n, _ = x_b.shape
    rels, masks = [], []
    for bi in range(bsz):
        rel, mask = _graph_glue(pos_b[bi], edge_index_list[bi], n)
        rels.append(rel)
        masks.append(mask)
    rel_b = jnp.stack(rels)
    mask_b = jnp.stack(masks)
    sel = jnp.asarray(np.repeat(np.eye(n, dtype=np.float32), n, axis=0))  # (P, n)
    w_slab, b_slab = pack_params(p)
    return _batched_call(x_b, rel_b, mask_b, sel, w_slab, b_slab)


def transformer_block(x, pos, edge_index, p):
    """Single-graph entry matching the torch module forward(x, pos, edge_index)."""
    y = transformer_block_batched(x[None], pos[None], [edge_index], p)
    return y[0]


# ----------------------------------------------------------------------------
# Deterministic parameter init (weights stored as [fan_in, fan_out], i.e. pre-transposed
# relative to torch's Linear.weight so the kernel can do x @ W directly).
# ----------------------------------------------------------------------------
def init_params(key):
    def dense(k, fan_in, fan_out, bias=True):
        k1, k2 = jax.random.split(k)
        bound = 1.0 / np.sqrt(fan_in)
        w = jax.random.uniform(k1, (fan_in, fan_out), jnp.float32, -bound, bound)
        b = jax.random.uniform(k2, (1, fan_out), jnp.float32, -bound, bound) if bias else None
        return w, b

    keys = jax.random.split(key, 9)
    p = {}
    p["w_in"], p["b_in"] = dense(keys[0], C_IN, C_IN)          # lin_in
    p["w_v"], _ = dense(keys[1], C_IN, C_OUT, bias=False)      # conv.lin
    p["w_src"], _ = dense(keys[2], C_IN, C_OUT, bias=False)    # conv.lin_src
    p["w_dst"], _ = dense(keys[3], C_IN, C_OUT, bias=False)    # conv.lin_dst
    p["wp1"], p["bp1"] = dense(keys[4], 3, HID)                # pos_nn layer 1
    p["wp2"], p["bp2"] = dense(keys[5], HID, C_OUT)            # pos_nn layer 2
    p["wa1"], p["ba1"] = dense(keys[6], C_OUT, HID)            # attn_nn layer 1
    p["wa2"], p["ba2"] = dense(keys[7], HID, C_OUT)            # attn_nn layer 2
    p["w_out"], p["b_out"] = dense(keys[8], C_OUT, C_OUT)      # lin_out
    return p


# Pure-JAX reference of the same dense formulation (for correctness check).
def reference(x, pos, edge_index, p):
    n = x.shape[0]
    src, dst = edge_index[0], edge_index[1]
    eye = jnp.eye(n, dtype=jnp.float32)
    adj = jnp.zeros((n, n), jnp.float32).at[dst, src].set(1.0)
    adj = adj * (1.0 - eye) + eye
    h = jax.nn.relu(x @ p["w_in"] + p["b_in"])
    xv, asrc, adst = h @ p["w_v"], h @ p["w_src"], h @ p["w_dst"]
    rel = pos[:, None, :] - pos[None, :, :]
    delta = jax.nn.relu(jax.nn.relu(rel @ p["wp1"] + p["bp1"]) @ p["wp2"] + p["bp2"])
    ap = adst[:, None, :] - asrc[None, :, :] + delta
    e = jax.nn.relu(jax.nn.relu(ap @ p["wa1"] + p["ba1"]) @ p["wa2"] + p["ba2"])
    mask = adj[:, :, None]
    neg = jnp.where(mask > 0, e, -1e30)
    m = jnp.max(neg, axis=1, keepdims=True)
    pr = jnp.exp(neg - m) * mask
    alpha = pr / jnp.sum(pr, axis=1, keepdims=True)
    out = jnp.sum(alpha * (xv[None, :, :] + delta), axis=1)
    return jax.nn.relu(out @ p["w_out"] + p["b_out"])


if __name__ == "__main__":
    key = jax.random.PRNGKey(0)
    kx, kp, kw, kx2, kp2 = jax.random.split(key, 5)
    x = jax.random.normal(kx, (N, C_IN), jnp.float32)
    pos = jax.random.normal(kp, (N, 3), jnp.float32)
    # deterministic graph: each node i receives edges from (i+1), (i+5), (i+9) mod N
    dst = np.repeat(np.arange(N), 3)
    src = (dst + np.tile(np.array([1, 5, 9]), N)) % N
    edge_index = jnp.asarray(np.stack([src, dst]), dtype=jnp.int32)

    params = init_params(kw)

    # single-graph path (matches the torch module forward)
    y = transformer_block(x, pos, edge_index, params)
    y = jax.block_until_ready(y)
    y_ref = reference(x, pos, edge_index, params)
    assert np.allclose(np.asarray(y), np.asarray(y_ref), rtol=1e-4, atol=1e-4), "mismatch vs reference"

    # batched path: 2 graphs, one grid step each, weights DMA'd once (parallel batch axis)
    x2 = jax.random.normal(kx2, (N, C_IN), jnp.float32)
    pos2 = jax.random.normal(kp2, (N, 3), jnp.float32)
    src2 = (dst + np.tile(np.array([2, 3, 7]), N)) % N
    edge_index2 = jnp.asarray(np.stack([src2, dst]), dtype=jnp.int32)
    yb = transformer_block_batched(jnp.stack([x, x2]), jnp.stack([pos, pos2]),
                                   [edge_index, edge_index2], params)
    yb = jax.block_until_ready(yb)
    assert np.allclose(np.asarray(yb[0]), np.asarray(y_ref), rtol=1e-4, atol=1e-4), "batch[0] mismatch"
    y_ref2 = reference(x2, pos2, edge_index2, params)
    assert np.allclose(np.asarray(yb[1]), np.asarray(y_ref2), rtol=1e-4, atol=1e-4), "batch[1] mismatch"

    print("KERNEL_OK")
</pallas_src>

<mosaic_0001>
module attributes {stable_mosaic.version = 11 : i64} {
  func.func @_fused_block_kernel(%arg0: i32, %arg1: memref<1x16x8xf32, #tpu.memory_space<vmem>>, %arg2: memref<1x256x3xf32, #tpu.memory_space<vmem>>, %arg3: memref<1x256x32xf32, #tpu.memory_space<vmem>>, %arg4: memref<256x16xf32, #tpu.memory_space<vmem>>, %arg5: memref<216x128xf32, #tpu.memory_space<vmem>>, %arg6: memref<8x128xf32, #tpu.memory_space<vmem>>, %arg7: memref<1x16x32xf32, #tpu.memory_space<vmem>>) attributes {dimension_semantics = [#tpu.dimension_semantics<parallel>], iteration_bounds = array<i64: 1>, scalar_prefetch = 0 : i64, scratch_operands = 0 : i64, tpu.core_type = #tpu.core_type<tc>, window_params = [{transform_indices = @transform_0, window_bounds = array<i64: 1, 16, 8>}, {transform_indices = @transform_1, window_bounds = array<i64: 1, 256, 3>}, {transform_indices = @transform_2, window_bounds = array<i64: 1, 256, 32>}, {pipeline_mode = #tpu.pipeline_mode<synchronous>, transform_indices = @transform_3, window_bounds = array<i64: 256, 16>}, {pipeline_mode = #tpu.pipeline_mode<synchronous>, transform_indices = @transform_4, window_bounds = array<i64: 216, 128>}, {pipeline_mode = #tpu.pipeline_mode<synchronous>, transform_indices = @transform_5, window_bounds = array<i64: 8, 128>}, {transform_indices = @transform_6, window_bounds = array<i64: 1, 16, 32>}]} {
    %c0 = arith.constant 0 : index
    %c0_0 = arith.constant 0 : index
    %0 = vector.load %arg5[%c0, %c0_0] : memref<216x128xf32, #tpu.memory_space<vmem>>, vector<8x8xf32>
    %c8 = arith.constant 8 : index
    %c0_1 = arith.constant 0 : index
    %1 = vector.load %arg5[%c8, %c0_1] : memref<216x128xf32, #tpu.memory_space<vmem>>, vector<8x96xf32>
    %c16 = arith.constant 16 : index
    %c0_2 = arith.constant 0 : index
    %2 = vector.load %arg5[%c16, %c0_2] : memref<216x128xf32, #tpu.memory_space<vmem>>, vector<3x64xf32>
    %c24 = arith.constant 24 : index
    %c0_3 = arith.constant 0 : index
    %3 = vector.load %arg5[%c24, %c0_3] : memref<216x128xf32, #tpu.memory_space<vmem>>, vector<64x32xf32>
    %c88 = arith.constant 88 : index
    %c0_4 = arith.constant 0 : index
    %4 = vector.load %arg5[%c88, %c0_4] : memref<216x128xf32, #tpu.memory_space<vmem>>, vector<32x64xf32>
    %c120 = arith.constant 120 : index
    %c0_5 = arith.constant 0 : index
    %5 = vector.load %arg5[%c120, %c0_5] : memref<216x128xf32, #tpu.memory_space<vmem>>, vector<64x32xf32>
    %c184 = arith.constant 184 : index
    %c0_6 = arith.constant 0 : index
    %6 = vector.load %arg5[%c184, %c0_6] : memref<216x128xf32, #tpu.memory_space<vmem>>, vector<32x32xf32>
    %c0_7 = arith.constant 0 : index
    %c0_8 = arith.constant 0 : index
    %7 = vector.load %arg6[%c0_7, %c0_8] : memref<8x128xf32, #tpu.memory_space<vmem>>, vector<1x8xf32>
    %c1 = arith.constant 1 : index
    %c0_9 = arith.constant 0 : index
    %8 = vector.load %arg6[%c1, %c0_9] : memref<8x128xf32, #tpu.memory_space<vmem>>, vector<1x64xf32>
    %c2 = arith.constant 2 : index
    %c0_10 = arith.constant 0 : index
    %9 = vector.load %arg6[%c2, %c0_10] : memref<8x128xf32, #tpu.memory_space<vmem>>, vector<1x32xf32>
    %c3 = arith.constant 3 : index
    %c0_11 = arith.constant 0 : index
    %10 = vector.load %arg6[%c3, %c0_11] : memref<8x128xf32, #tpu.memory_space<vmem>>, vector<1x64xf32>
    %c4 = arith.constant 4 : index
    %c0_12 = arith.constant 0 : index
    %11 = vector.load %arg6[%c4, %c0_12] : memref<8x128xf32, #tpu.memory_space<vmem>>, vector<1x32xf32>
    %c5 = arith.constant 5 : index
    %c0_13 = arith.constant 0 : index
    %12 = vector.load %arg6[%c5, %c0_13] : memref<8x128xf32, #tpu.memory_space<vmem>>, vector<1x32xf32>
    %c0_14 = arith.constant 0 : index
    %c0_15 = arith.constant 0 : index
    %c0_16 = arith.constant 0 : index
    %13 = vector.load %arg1[%c0_14, %c0_15, %c0_16] : memref<1x16x8xf32, #tpu.memory_space<vmem>>, vector<1x16x8xf32>
    %14 = vector.shape_cast %13 : vector<1x16x8xf32> to vector<16x8xf32>
    %cst = arith.constant dense<0.000000e+00> : vector<16x8xf32>
    %15 = tpu.matmul %14, %0, %cst {dimension_numbers = #tpu.dot_dimension_numbers<[1], [0], [0], [1], [0, 0, 1, 1], [], []>} : vector<16x8xf32>, vector<8x8xf32>, vector<16x8xf32> -> vector<16x8xf32>
    %16 = vector.broadcast %7 : vector<1x8xf32> to vector<16x8xf32>
    %17 = arith.addf %15, %16 : vector<16x8xf32>
    %cst_17 = arith.constant 0.000000e+00 : f32
    %18 = vector.broadcast %cst_17 : f32 to vector<16x8xf32>
    %19 = arith.maximumf %17, %18 : vector<16x8xf32>
    %cst_18 = arith.constant dense<0.000000e+00> : vector<16x96xf32>
    %20 = tpu.matmul %19, %1, %cst_18 {dimension_numbers = #tpu.dot_dimension_numbers<[1], [0], [0], [1], [0, 0, 1, 1], [], []>} : vector<16x8xf32>, vector<8x96xf32>, vector<16x96xf32> -> vector<16x96xf32>
    %21 = vector.extract_strided_slice %20 {offsets = [0, 0], sizes = [16, 32], strides = [1, 1]} : vector<16x96xf32> to vector<16x32xf32>
    %22 = vector.extract_strided_slice %20 {offsets = [0, 32], sizes = [16, 32], strides = [1, 1]} : vector<16x96xf32> to vector<16x32xf32>
    %23 = vector.extract_strided_slice %20 {offsets = [0, 64], sizes = [16, 32], strides = [1, 1]} : vector<16x96xf32> to vector<16x32xf32>
    %c0_19 = arith.constant 0 : index
    %c0_20 = arith.constant 0 : index
    %24 = vector.load %arg4[%c0_19, %c0_20] : memref<256x16xf32, #tpu.memory_space<vmem>>, vector<256x16xf32>
    %cst_21 = arith.constant dense<0.000000e+00> : vector<256x32xf32>
    %25 = tpu.matmul %24, %21, %cst_21 {dimension_numbers = #tpu.dot_dimension_numbers<[1], [0], [0], [1], [0, 0, 1, 1], [], []>} : vector<256x16xf32>, vector<16x32xf32>, vector<256x32xf32> -> vector<256x32xf32>
    %c0_22 = arith.constant 0 : index
    %c0_23 = arith.constant 0 : index
    %c0_24 = arith.constant 0 : index
    %26 = vector.load %arg2[%c0_22, %c0_23, %c0_24] : memref<1x256x3xf32, #tpu.memory_space<vmem>>, vector<1x256x3xf32>
    %27 = vector.shape_cast %26 : vector<1x256x3xf32> to vector<256x3xf32>
    %cst_25 = arith.constant dense<0.000000e+00> : vector<256x64xf32>
    %28 = tpu.matmul %27, %2, %cst_25 {dimension_numbers = #tpu.dot_dimension_numbers<[1], [0], [0], [1], [0, 0, 1, 1], [], []>} : vector<256x3xf32>, vector<3x64xf32>, vector<256x64xf32> -> vector<256x64xf32>
    %29 = vector.broadcast %8 : vector<1x64xf32> to vector<256x64xf32>
    %30 = arith.addf %28, %29 : vector<256x64xf32>
    %cst_26 = arith.constant 0.000000e+00 : f32
    %31 = vector.broadcast %cst_26 : f32 to vector<256x64xf32>
    %32 = arith.maximumf %30, %31 : vector<256x64xf32>
    %cst_27 = arith.constant dense<0.000000e+00> : vector<256x32xf32>
    %33 = tpu.matmul %32, %3, %cst_27 {dimension_numbers = #tpu.dot_dimension_numbers<[1], [0], [0], [1], [0, 0, 1, 1], [], []>} : vector<256x64xf32>, vector<64x32xf32>, vector<256x32xf32> -> vector<256x32xf32>
    %34 = vector.broadcast %9 : vector<1x32xf32> to vector<256x32xf32>
    %35 = arith.addf %33, %34 : vector<256x32xf32>
    %cst_28 = arith.constant 0.000000e+00 : f32
    %36 = vector.broadcast %cst_28 : f32 to vector<256x32xf32>
    %37 = arith.maximumf %35, %36 : vector<256x32xf32>
    %38 = vector.shape_cast %37 : vector<256x32xf32> to vector<16x16x32xf32>
    %39 = vector.shape_cast %25 : vector<256x32xf32> to vector<16x16x32xf32>
    %40 = vector.shape_cast %23 : vector<16x32xf32> to vector<1x16x32xf32>
    %41 = vector.broadcast %40 : vector<1x16x32xf32> to vector<16x16x32xf32>
    %42 = arith.subf %39, %41 : vector<16x16x32xf32>
    %43 = arith.addf %42, %38 : vector<16x16x32xf32>
    %44 = vector.shape_cast %43 : vector<16x16x32xf32> to vector<256x32xf32>
    %cst_29 = arith.constant dense<0.000000e+00> : vector<256x64xf32>
    %45 = tpu.matmul %44, %4, %cst_29 {dimension_numbers = #tpu.dot_dimension_numbers<[1], [0], [0], [1], [0, 0, 1, 1], [], []>} : vector<256x32xf32>, vector<32x64xf32>, vector<256x64xf32> -> vector<256x64xf32>
    %46 = vector.broadcast %10 : vector<1x64xf32> to vector<256x64xf32>
    %47 = arith.addf %45, %46 : vector<256x64xf32>
    %cst_30 = arith.constant 0.000000e+00 : f32
    %48 = vector.broadcast %cst_30 : f32 to vector<256x64xf32>
    %49 = arith.maximumf %47, %48 : vector<256x64xf32>
    %cst_31 = arith.constant dense<0.000000e+00> : vector<256x32xf32>
    %50 = tpu.matmul %49, %5, %cst_31 {dimension_numbers = #tpu.dot_dimension_numbers<[1], [0], [0], [1], [0, 0, 1, 1], [], []>} : vector<256x64xf32>, vector<64x32xf32>, vector<256x32xf32> -> vector<256x32xf32>
    %51 = vector.broadcast %11 : vector<1x32xf32> to vector<256x32xf32>
    %52 = arith.addf %50, %51 : vector<256x32xf32>
    %cst_32 = arith.constant 0.000000e+00 : f32
    %53 = vector.broadcast %cst_32 : f32 to vector<256x32xf32>
    %54 = arith.maximumf %52, %53 : vector<256x32xf32>
    %c0_33 = arith.constant 0 : index
    %c0_34 = arith.constant 0 : index
    %c0_35 = arith.constant 0 : index
    %55 = vector.load %arg3[%c0_33, %c0_34, %c0_35] : memref<1x256x32xf32, #tpu.memory_space<vmem>>, vector<1x256x32xf32>
    %56 = vector.shape_cast %55 : vector<1x256x32xf32> to vector<256x32xf32>
    %57 = arith.addf %54, %56 : vector<256x32xf32>
    %58 = vector.shape_cast %57 : vector<256x32xf32> to vector<16x16x32xf32>
    %cst_36 = arith.constant dense<0xFF800000> : vector<16x32xf32>
    %59 = vector.multi_reduction <maximumf>, %58, %cst_36 [1] : vector<16x16x32xf32> to vector<16x32xf32>
    %60 = vector.shape_cast %59 : vector<16x32xf32> to vector<16x1x32xf32>
    %61 = vector.broadcast %60 : vector<16x1x32xf32> to vector<16x16x32xf32>
    %62 = arith.subf %58, %61 : vector<16x16x32xf32>
    %63 = math.exp %62 : vector<16x16x32xf32>
    %64 = vector.shape_cast %22 : vector<16x32xf32> to vector<1x16x32xf32>
    %65 = vector.broadcast %64 : vector<1x16x32xf32> to vector<16x16x32xf32>
    %66 = arith.addf %65, %38 : vector<16x16x32xf32>
    %67 = arith.mulf %63, %66 : vector<16x16x32xf32>
    %68 = tpu.concatenate %67, %63 in 2 : vector<16x16x32xf32>, vector<16x16x32xf32> -> vector<16x16x64xf32>
    %cst_37 = arith.constant dense<0.000000e+00> : vector<16x64xf32>
    %69 = vector.multi_reduction <add>, %68, %cst_37 [1] : vector<16x16x64xf32> to vector<16x64xf32>
    %70 = vector.extract_strided_slice %69 {offsets = [0, 0], sizes = [16, 32], strides = [1, 1]} : vector<16x64xf32> to vector<16x32xf32>
    %71 = vector.extract_strided_slice %69 {offsets = [0, 32], sizes = [16, 32], strides = [1, 1]} : vector<16x64xf32> to vector<16x32xf32>
    %72 = tpu.reciprocal %71 : vector<16x32xf32> -> vector<16x32xf32>
    %73 = arith.mulf %70, %72 : vector<16x32xf32>
    %cst_38 = arith.constant dense<0.000000e+00> : vector<16x32xf32>
    %74 = tpu.matmul %73, %6, %cst_38 {dimension_numbers = #tpu.dot_dimension_numbers<[1], [0], [0], [1], [0, 0, 1, 1], [], []>} : vector<16x32xf32>, vector<32x32xf32>, vector<16x32xf32> -> vector<16x32xf32>
    %75 = vector.broadcast %12 : vector<1x32xf32> to vector<16x32xf32>
    %76 = arith.addf %74, %75 : vector<16x32xf32>
    %cst_39 = arith.constant 0.000000e+00 : f32
    %77 = vector.broadcast %cst_39 : f32 to vector<16x32xf32>
    %78 = arith.maximumf %76, %77 : vector<16x32xf32>
    %c0_40 = arith.constant 0 : index
    %c0_41 = arith.constant 0 : index
    %c0_42 = arith.constant 0 : index
    %79 = vector.load %arg7[%c0_40, %c0_41, %c0_42] : memref<1x16x32xf32, #tpu.memory_space<vmem>>, vector<1x16x32xf32>
    %80 = vector.shape_cast %79 : vector<1x16x32xf32> to vector<16x32xf32>
    %81 = vector.shape_cast %78 : vector<16x32xf32> to vector<1x16x32xf32>
    tpu.vector_store %arg7[%c0_40, %c0_41, %c0_42], %81 {strides = array<i32>} : memref<1x16x32xf32, #tpu.memory_space<vmem>>, vector<1x16x32xf32>,
    return
  }
  func.func @transform_0(%arg0: i32) -> (i32, i32, i32) {
    %c0_i32 = arith.constant 0 : i32
    %c0_i32_0 = arith.constant 0 : i32
    %c0_i32_1 = arith.constant 0 : i32
    return %arg0, %c0_i32, %c0_i32_0 : i32, i32, i32
  }
  func.func @transform_1(%arg0: i32) -> (i32, i32, i32) {
    %c0_i32 = arith.constant 0 : i32
    %c0_i32_0 = arith.constant 0 : i32
    %c0_i32_1 = arith.constant 0 : i32
    return %arg0, %c0_i32, %c0_i32_0 : i32, i32, i32
  }
  func.func @transform_2(%arg0: i32) -> (i32, i32, i32) {
    %c0_i32 = arith.constant 0 : i32
    %c0_i32_0 = arith.constant 0 : i32
    %c0_i32_1 = arith.constant 0 : i32
    return %arg0, %c0_i32, %c0_i32_0 : i32, i32, i32
  }
  func.func @transform_3(%arg0: i32) -> (i32, i32) {
    %c0_i32 = arith.constant 0 : i32
    %c0_i32_0 = arith.constant 0 : i32
    %c0_i32_1 = arith.constant 0 : i32
    return %c0_i32, %c0_i32_0 : i32, i32
  }
  func.func @transform_4(%arg0: i32) -> (i32, i32) {
    %c0_i32 = arith.constant 0 : i32
    %c0_i32_0 = arith.constant 0 : i32
    %c0_i32_1 = arith.constant 0 : i32
    return %c0_i32, %c0_i32_0 : i32, i32
  }
  func.func @transform_5(%arg0: i32) -> (i32, i32) {
    %c0_i32 = arith.constant 0 : i32
    %c0_i32_0 = arith.constant 0 : i32
    %c0_i32_1 = arith.constant 0 : i32
    return %c0_i32, %c0_i32_0 : i32, i32
  }
  func.func @transform_6(%arg0: i32) -> (i32, i32, i32) {
    %c0_i32 = arith.constant 0 : i32
    %c0_i32_0 = arith.constant 0 : i32
    %c0_i32_1 = arith.constant 0 : i32
    return %arg0, %c0_i32, %c0_i32_0 : i32, i32, i32
  }
}

</mosaic_0001>

<bundles_post_ra>
// kernel: tpu_custom_call.1
= control target key start
LH: loop header
LB: loop body
LE: loop exit
PB: predicated region body
PF: predicated region fallthrough
CT: control target
= control target key end

     0   :  { %vm63_vm0 = vcmask 64512   ;;  %s5733_s0 = inlined_call_operand.vmem [shape: f32[1,16,8], index: 0, kind: input, shape index: {}]   ;;  %s5734_s1 = inlined_call_operand.vmem [shape: f32[1,256,3], index: 1, kind: input, shape index: {}]   ;;  %s5735_s2 = inlined_call_operand.vmem [shape: f32[1,256,32], index: 2, kind: input, shape index: {}]   ;;  %s5736_s3 = inlined_call_operand.vmem [shape: f32[256,16], index: 3, kind: input, shape index: {}]   ;;  %s5737_s4 = inlined_call_operand.vmem [shape: f32[216,128], index: 4, kind: input, shape index: {}]   ;;  %s5738_s5 = inlined_call_operand.vmem [shape: f32[8,128], index: 5, kind: input, shape index: {}]   ;;  %s5739_s6 = inlined_call_operand.hbm [shape: f32[1,16,32], index: 6, kind: output, shape index: {}]  }
   0x1   :  { %v24_v0 = vld [vmem:[%s5737_s4] sm:$0xff]  ;;  %v58_v2 = vld [vmem:[%s5733_s0 + $0x8] sm:$0xff] }
   0x2   :  { %v57_v1 = vld [vmem:[%s5733_s0] sm:$0xff]  ;;  %3667 = vmatprep.subr.mxu0 %v24_v0 }
   0x3   :  { %3669 = vmatprep.mubr.msk.f32.mxu0 %vm63_vm0, %v57_v1 }
   0x4   :  { %11 = vsyncpa [#allocation3], 0  ;;  %3668 = vmatpush3.msra.mxu0 %v24_v0  ;;  %v25_v3 = vld [vmem:[%s5737_s4 + $0x8] sm:$0xff]  ;;  %v3299_v4 = vld [vmem:[%s5738_s5] ss:$0 sm:$0xff]  ;;  %vm260_vm1 = vcmask 130048  }
   0x5   :  { %3670 = vmatmul.mubr.msk.f32.vlgmr.msra.gmra.mrb[0].mxu0 %vm63_vm0, %v58_v2  ;;  %3672 = vmatprep.subr.mxu1 %v25_v3  ;;  %v228_v11 = vld [vmem:[%s5736_s3] sm:$0xff]  ;;  %v246_v12 = vld [vmem:[%s5736_s3 + $0x90] sm:$0xff]  ;;  %v27_v14 = vld [vmem:[%s5737_s4 + $0x18] sm:$0xff]  ;;  %s4154_s14 = smov 64   ;;  %vm715_vm2 = vcmask 1042432   ;;  %vm618_vm3 = vcmask 23552  }
   0x6   :  { %3673 = vmatpush3.msra.mxu1 %v25_v3  ;;  %3681 = vmatprep.mubr.msk.f32.mxu0 %vm260_vm1, %v228_v11  ;;  %v28_v15 = vld [vmem:[%s5737_s4 + $0x20] sm:$0xff]  ;;  %v26_v18 = vld [vmem:[%s5737_s4 + $0x10] sm:$0x7]  ;;  %v229_v20 = vld [vmem:[%s5736_s3 + $0x8] sm:$0xff]  ;;  %vm980_vm4 = vcmask 523264   ;;  %s4155_s11 = smov 32  }
   0x7   :  { %v3978_v19 = vpack.c.bf16 %v28_v15, %v27_v14  ;;  %v247_v21 = vld [vmem:[%s5736_s3 + $0x98] sm:$0xff]  ;;  %v230_v22 = vld [vmem:[%s5736_s3 + $0x10] sm:$0xff]  ;;  %v248_v23 = vld [vmem:[%s5736_s3 + $0xa0] sm:$0xff]  ;;  %vm1410_vm5 = vcmask 261120   ;;  %s4156_s26 = smov 96   ;;  %vm3166_vm6 = vcmask 1041409  }
   0x8   :  { %v231_v24 = vld [vmem:[%s5736_s3 + $0x18] sm:$0xff]  ;;  %v249_v25 = vld [vmem:[%s5736_s3 + $0xa8] sm:$0xff]  ;;  %v232_v26 = vld [vmem:[%s5736_s3 + $0x20] sm:$0xff]  ;;  %vm3169_vm7 = vcmask 1042434   ;;  %vm3172_vm8 = vcmask 1043459   ;;  %vm3175_vm9 = vcmask 1044484  }
   0x9   :  { %v250_v27 = vld [vmem:[%s5736_s3 + $0xb0] sm:$0xff]  ;;  %v233_v28 = vld [vmem:[%s5736_s3 + $0x28] sm:$0xff]  ;;  %v251_v29 = vld [vmem:[%s5736_s3 + $0xb8] sm:$0xff]  ;;  %vm3178_vm10 = vcmask 1045509   ;;  %vm3181_vm11 = vcmask 1046534   ;;  %vm3184_vm12 = vcmask 1047559  }
   0xa   :  { %v234_v30 = vld [vmem:[%s5736_s3 + $0x30] sm:$0xff]  ;;  %v252_v31 = vld [vmem:[%s5736_s3 + $0xc0] sm:$0xff]  ;;  %v235_v32 = vld [vmem:[%s5736_s3 + $0x38] sm:$0xff]  ;;  %s4157_s25 = smov [#allocation2]  }
   0xb   :  { %v253_v33 = vld [vmem:[%s5736_s3 + $0xc8] sm:$0xff]  ;;  %v236_v34 = vld [vmem:[%s5736_s3 + $0x40] sm:$0xff]  ;;  %v254_v35 = vld [vmem:[%s5736_s3 + $0xd0] sm:$0xff]  ;;  %s3288_s27 = sshll.u32 %s4157_s25, 4  ;;  %s3289_s27 = int_to_ptr.vmem [resolvable:$true] %s3288_s27 }
   0xc   :  { %v237_v36 = vld [vmem:[%s5736_s3 + $0x48] sm:$0xff]  ;;  %v255_v37 = vld [vmem:[%s5736_s3 + $0xd8] sm:$0xff]  ;;  %v238_v38 = vld [vmem:[%s5736_s3 + $0x50] sm:$0xff]  ;;  %s4130_s28 = scalar_lea.vmem %s3289_s27, 256  ;;  %p4135_p1 = scmp.lt.s32.totalorder %s3289_s27, %s3289_s27 }
   0xd   :  { %v256_v39 = vld [vmem:[%s5736_s3 + $0xe0] sm:$0xff]  ;;  %v239_v40 = vld [vmem:[%s5736_s3 + $0x58] sm:$0xff]  ;;  %v257_v41 = vld [vmem:[%s5736_s3 + $0xe8] sm:$0xff]  ;;  %p4131_p0 = scmp.ne.s32.totalorder %s3289_s27, %s4130_s28  ;;  %p4136_p2 = scmp.lt.s32.totalorder %s4130_s28, %s4130_s28 }
   0xe   :  { %v240_v42 = vld [vmem:[%s5736_s3 + $0x60] sm:$0xff]  ;;  %v258_v43 = vld [vmem:[%s5736_s3 + $0xf0] sm:$0xff]  ;;  %v241_v44 = vld [vmem:[%s5736_s3 + $0x68] sm:$0xff] }
   0xf   :  { %v259_v45 = vld [vmem:[%s5736_s3 + $0xf8] sm:$0xff]  ;;  %v242_v46 = vld [vmem:[%s5736_s3 + $0x70] sm:$0xff]  ;;  %v582_v47 = vld [vmem:[%s5734_s1] sm:$0xff]  ;;  %p4137_p3 = por %p4136_p2, %p4135_p1 }
  0x10   :  { %v243_v48 = vld [vmem:[%s5736_s3 + $0x78] sm:$0xff]  ;;  %v583_v49 = vld [vmem:[%s5734_s1 + $0x8] sm:$0xff]  ;;  %v244_v50 = vld [vmem:[%s5736_s3 + $0x80] sm:$0xff] }
  0x11   :  { %v584_v51 = vld [vmem:[%s5734_s1 + $0x10] sm:$0xff]  ;;  %v245_v52 = vld [vmem:[%s5736_s3 + $0x88] sm:$0xff]  ;;  %v585_v53 = vld [vmem:[%s5734_s1 + $0x18] sm:$0xff]  ;;  %p4138_p4 = pnand %p4137_p3, %p4131_p0 }
  0x12   :  { %v586_v54 = vld [vmem:[%s5734_s1 + $0x20] sm:$0xff]  ;;  %v587_v55 = vld [vmem:[%s5734_s1 + $0x28] sm:$0xff]  ;;  %v588_v56 = vld [vmem:[%s5734_s1 + $0x30] sm:$0xff] }
  0x13   :  { %v589_v57 = vld [vmem:[%s5734_s1 + $0x38] sm:$0xff]  ;;  %v590_v58 = vld [vmem:[%s5734_s1 + $0x40] sm:$0xff]  ;;  %v591_v59 = vld [vmem:[%s5734_s1 + $0x48] sm:$0xff] }
  0x14   :  { %v592_v60 = vld [vmem:[%s5734_s1 + $0x50] sm:$0xff]  ;;  %v593_v61 = vld [vmem:[%s5734_s1 + $0x58] sm:$0xff]  ;;  %v594_v62 = vld [vmem:[%s5734_s1 + $0x60] sm:$0xff] }
  0x15   :  { %v595_v63 = vld [vmem:[%s5734_s1 + $0x68] sm:$0xff]  ;;  %v596_v0 = vld [vmem:[%s5734_s1 + $0x70] sm:$0xff]  ;;  %v597_v1 = vld [vmem:[%s5734_s1 + $0x78] sm:$0xff] }
  0x16   :  { %v598_v2 = vld [vmem:[%s5734_s1 + $0x80] sm:$0xff]  ;;  %v599_v3 = vld [vmem:[%s5734_s1 + $0x88] sm:$0xff]  ;;  %v609_v14 = vld [vmem:[%s5734_s1 + $0xd8] sm:$0xff] }
  0x17   :  { %v607_v11 = vld [vmem:[%s5734_s1 + $0xc8] sm:$0xff]  ;;  %v610_v15 = vld [vmem:[%s5734_s1 + $0xe0] sm:$0xff] }
  0xd8   :  { %v3671_v5 = vpop.f32.mrb[0].mxu0 }
  0xd9   :  { %v142_v6 = vadd.f32 %v3671_v5, %v3299_v4  ;;  %v136_v7 = vpop.f32.mrb[1].mxu0  ;;  %v601_v5 = vld [vmem:[%s5734_s1 + $0x98] sm:$0xff] }
  0xda   :  { %v137_v8 = vadd.f32 %v3299_v4, %v136_v7  ;;  %v600_v4 = vld [vmem:[%s5734_s1 + $0x90] sm:$0xff]  ;;  %v603_v7 = vld [vmem:[%s5734_s1 + $0xa8] sm:$0xff] }
  0xdb   :  { %v146_v10 = vmax.f32 %v142_v6, 0.0  ;;  %v602_v6 = vld [vmem:[%s5734_s1 + $0xa0] sm:$0xff] }
  0xdc   :  { %v145_v9 = vmax.f32 %v137_v8, 0.0  ;;  %v604_v8 = vld [vmem:[%s5734_s1 + $0xb0] sm:$0xff] }
  0xde   :  { %3674 = vmatprep.mubr.msk.f32.mxu1 %vm63_vm0, %v145_v9  ;;  %v605_v9 = vld [vmem:[%s5734_s1 + $0xb8] sm:$0xff] }
  0xdf   :  { %3675 = vmatmul.mubr.msk.f32.vlgmr.msra.gmra.mrb[0].mxu1 %vm63_vm0, %v146_v10  ;;  %v606_v10 = vld [vmem:[%s5734_s1 + $0xc0] sm:$0xff] }
  0xe0   :  { %3708 = vmatprep.mubr.msk.f32.mxu1 %vm260_vm1, %v246_v12  ;;  %v608_v12 = vld [vmem:[%s5734_s1 + $0xd0] sm:$0xff] }
 0x1b2   :  { %v4222_v13 = vpop.f32.mrb[0].mxu1 }
 0x1b3   :  { %v4230_v16 = vpop.f32.mrb[1].mxu1 }
 0x1b4   :  { %1336 = vrot.lane.b32.xlu0 %v4230_v16, %s4154_s14  ;;  %v3974_v17 = vpack.c.bf16 %v4222_v13, %v4230_v16 }
 0x1b6   :  { %3975 = vmatprep.subr.bf16.mxu0 %v3974_v17  ;;  %4026 = vmatprep.subr.bf16.mxu1 %v3974_v17 }
 0x1b7   :  { %3977 = vmatpush3.bf16.msra.mxu0 %v3974_v17  ;;  %4027 = vmatpush3.bf16.msra.mxu1 %v3974_v17  ;;  %v611_v17 = vld [vmem:[%s5734_s1 + $0xe8] sm:$0xff] }
 0x1b8   :  { %1338 = vrot.lane.b32.xlu0 %v4222_v13, %s4154_s14  ;;  %3729 = vmatprep.subr.msk.mxu1 %vm715_vm2, %v26_v18 }
 0x1b9   :  { %3979 = vmatprep.subr.bf16.mxu0 %v3978_v19 }
 0x1ba   :  { %3682 = vmatmul.mubr.msk.f32.vlgmr.msra.gmra.mrb[2].mxu0 %vm260_vm1, %v229_v20  ;;  %3709 = vmatmul.mubr.msk.f32.vlgmr.msra.gmra.mrb[2].mxu1 %vm260_vm1, %v247_v21  ;;  %v29_v20 = vld [vmem:[%s5737_s4 + $0x28] sm:$0xff]  ;;  %v30_v21 = vld [vmem:[%s5737_s4 + $0x30] sm:$0xff] }
 0x1bb   :  { %3730 = vmatpush3.msk.msra.mxu1 %vm715_vm2, %v26_v18  ;;  %3684 = vmatprep.mubr.msk.f32.mxu0 %vm260_vm1, %v230_v22  ;;  %v612_v18 = vld [vmem:[%s5734_s1 + $0xf0] sm:$0xff]  ;;  %v3982_v22 = vpack.c.bf16 %v30_v21, %v29_v20 }
 0x1bc   :  { %3711 = vmatprep.mubr.msk.f32.mxu1 %vm260_vm1, %v248_v23  ;;  %3981 = vmatpush3.bf16.msra.mxu0 %v3978_v19  ;;  %v613_v19 = vld [vmem:[%s5734_s1 + $0xf8] sm:$0xff] }
 0x1bd   :  { %3983 = vmatprep.subr.bf16.mxu0 %v3982_v22  ;;  %v31_v23 = vld [vmem:[%s5737_s4 + $0x38] sm:$0xff] }
 0x1be   :  { %3685 = vmatmul.mubr.msk.f32.gmra.mrb[4].mxu0 %vm260_vm1, %v231_v24  ;;  %3712 = vmatmul.mubr.msk.f32.gmra.mrb[4].mxu1 %vm260_vm1, %v249_v25  ;;  %v32_v24 = vld [vmem:[%s5737_s4 + $0x40] sm:$0xff] }
 0x1bf   :  { %3687 = vmatprep.mubr.msk.f32.mxu0 %vm260_vm1, %v232_v26  ;;  %3714 = vmatprep.mubr.msk.f32.mxu1 %vm260_vm1, %v250_v27  ;;  %v3986_v25 = vpack.c.bf16 %v32_v24, %v31_v23  ;;  %v33_v26 = vld [vmem:[%s5737_s4 + $0x48] sm:$0xff]  ;;  %v34_v27 = vld [vmem:[%s5737_s4 + $0x50] sm:$0xff] }
 0x1c0   :  { %3985 = vmatpush3.bf16.msra.mxu0 %v3982_v22 }
 0x1c1   :  { %3987 = vmatprep.subr.bf16.mxu0 %v3986_v25 }
 0x1c2   :  { %3688 = vmatmul.mubr.msk.f32.gmra.mrb[6].mxu0 %vm260_vm1, %v233_v28  ;;  %3715 = vmatmul.mubr.msk.f32.gmra.mrb[6].mxu1 %vm260_vm1, %v251_v29  ;;  %v3990_v28 = vpack.c.bf16 %v34_v27, %v33_v26  ;;  %v35_v29 = vld [vmem:[%s5737_s4 + $0x58] sm:$0xff] }
 0x1c3   :  { %3690 = vmatprep.mubr.msk.f32.mxu0 %vm260_vm1, %v234_v30  ;;  %3717 = vmatprep.mubr.msk.f32.mxu1 %vm260_vm1, %v252_v31  ;;  %v36_v30 = vld [vmem:[%s5737_s4 + $0x60] sm:$0xff]  ;;  %v37_v31 = vld [vmem:[%s5737_s4 + $0x68] sm:$0xff] }
 0x1c4   :  { %3989 = vmatpush3.bf16.msra.mxu0 %v3986_v25 }
 0x1c5   :  { %3991 = vmatprep.subr.bf16.mxu0 %v3990_v28 }
 0x1c6   :  { %3691 = vmatmul.mubr.msk.f32.gmra.mrb[8].mxu0 %vm260_vm1, %v235_v32  ;;  %3718 = vmatmul.mubr.msk.f32.gmra.mrb[8].mxu1 %vm260_vm1, %v253_v33  ;;  %v3994_v32 = vpack.c.bf16 %v36_v30, %v35_v29  ;;  %v38_v33 = vld [vmem:[%s5737_s4 + $0x70] sm:$0xff] }
 0x1c7   :  { %3693 = vmatprep.mubr.msk.f32.mxu0 %vm260_vm1, %v236_v34  ;;  %3720 = vmatprep.mubr.msk.f32.mxu1 %vm260_vm1, %v254_v35  ;;  %v3998_v34 = vpack.c.bf16 %v38_v33, %v37_v31 }
 0x1c8   :  { %3993 = vmatpush3.bf16.msra.mxu0 %v3990_v28  ;;  %3995 = vmatprep.subr.bf16.mxu1 %v3994_v32 }
 0x1ca   :  { %3694 = vmatmul.mubr.msk.f32.gmra.mrb[10].mxu0 %vm260_vm1, %v237_v36  ;;  %3721 = vmatmul.mubr.msk.f32.gmra.mrb[10].mxu1 %vm260_vm1, %v255_v37 }
 0x1cb   :  { %3696 = vmatprep.mubr.msk.f32.mxu0 %vm260_vm1, %v238_v38  ;;  %3723 = vmatprep.mubr.msk.f32.mxu1 %vm260_vm1, %v256_v39 }
 0x1ce   :  { %3697 = vmatmul.mubr.msk.f32.gmra.mrb[12].mxu0 %vm260_vm1, %v239_v40  ;;  %3724 = vmatmul.mubr.msk.f32.gmra.mrb[12].mxu1 %vm260_vm1, %v257_v41 }
 0x1cf   :  { %3699 = vmatprep.mubr.msk.f32.mxu0 %vm260_vm1, %v240_v42  ;;  %3726 = vmatprep.mubr.msk.f32.mxu1 %vm260_vm1, %v258_v43 }
 0x1d2   :  { %3700 = vmatmul.mubr.msk.f32.gmra.mrb[14].mxu0 %vm260_vm1, %v241_v44  ;;  %3727 = vmatmul.mubr.msk.f32.gmra.mrb[14].mxu1 %vm260_vm1, %v259_v45 }
 0x1d3   :  { %3702 = vmatprep.mubr.msk.f32.mxu0 %vm260_vm1, %v242_v46  ;;  %3731 = vmatprep.mubr.msk.f32.mxu1 %vm618_vm3, %v582_v47 }
 0x1d6   :  { %3703 = vmatmul.mubr.msk.f32.gmra.mrb[16].mxu0 %vm260_vm1, %v243_v48  ;;  %3732 = vmatmul.mubr.msk.f32.vlgmr.msra.gmra.mrb[16].mxu1 %vm618_vm3, %v583_v49 }
 0x1d7   :  { %3705 = vmatprep.mubr.msk.f32.mxu0 %vm260_vm1, %v244_v50  ;;  %3734 = vmatprep.mubr.msk.f32.mxu1 %vm618_vm3, %v584_v51 }
 0x1d8   :  { %3997 = vmatpush3.bf16.msra.mxu1 %v3994_v32 }
 0x1d9   :  { %3999 = vmatprep.subr.bf16.mxu1 %v3998_v34 }
 0x1da   :  { %3706 = vmatmul.mubr.msk.f32.gmra.mrb[18].mxu0 %vm260_vm1, %v245_v52  ;;  %3735 = vmatmul.mubr.msk.f32.gmra.mrb[18].mxu1 %vm618_vm3, %v585_v53 }
 0x1db   :  { %3737 = vmatprep.mubr.msk.f32.mxu1 %vm618_vm3, %v586_v54 }
 0x1dc   :  { %4001 = vmatpush3.bf16.msra.mxu1 %v3998_v34 }
 0x1de   :  { %3738 = vmatmul.mubr.msk.f32.gmra.mrb[20].mxu1 %vm618_vm3, %v587_v55 }
 0x1df   :  { %3740 = vmatprep.mubr.msk.f32.mxu1 %vm618_vm3, %v588_v56 }
 0x1e2   :  { %3741 = vmatmul.mubr.msk.f32.gmra.mrb[22].mxu1 %vm618_vm3, %v589_v57 }
 0x1e3   :  { %3743 = vmatprep.mubr.msk.f32.mxu1 %vm618_vm3, %v590_v58 }
 0x1e6   :  { %3744 = vmatmul.mubr.msk.f32.gmra.mrb[24].mxu1 %vm618_vm3, %v591_v59 }
 0x1e7   :  { %3746 = vmatprep.mubr.msk.f32.mxu1 %vm618_vm3, %v592_v60 }
 0x1ea   :  { %3747 = vmatmul.mubr.msk.f32.gmra.mrb[26].mxu1 %vm618_vm3, %v593_v61 }
 0x1eb   :  { %3749 = vmatprep.mubr.msk.f32.mxu1 %vm618_vm3, %v594_v62 }
 0x1ee   :  { %3750 = vmatmul.mubr.msk.f32.gmra.mrb[28].mxu1 %vm618_vm3, %v595_v63  ;;  %v4576_v63 = vld [vmem:[%s5738_s5 + $0x1] ss:$0 sm:$0xff] }
 0x1ef   :  { %3752 = vmatprep.mubr.msk.f32.mxu1 %vm618_vm3, %v596_v0 }
 0x1f2   :  { %3753 = vmatmul.mubr.msk.f32.gmra.mrb[30].mxu1 %vm618_vm3, %v597_v1 }
 0x1f3   :  { %3755 = vmatprep.mubr.msk.f32.mxu1 %vm618_vm3, %v598_v2 }
 0x1f6   :  { %3756 = vmatmul.mubr.msk.f32.gmra.mrb[32].mxu1 %vm618_vm3, %v599_v3 }
 0x1f7   :  { %3758 = vmatprep.mubr.msk.f32.mxu1 %vm618_vm3, %v600_v4 }
 0x1fa   :  { %3759 = vmatmul.mubr.msk.f32.gmra.mrb[34].mxu1 %vm618_vm3, %v601_v5 }
 0x1fb   :  { %3761 = vmatprep.mubr.msk.f32.mxu1 %vm618_vm3, %v602_v6 }
 0x1fe   :  { %3762 = vmatmul.mubr.msk.f32.gmra.mrb[36].mxu1 %vm618_vm3, %v603_v7 }
 0x1ff   :  { %3764 = vmatprep.mubr.msk.f32.mxu1 %vm618_vm3, %v604_v8 }
 0x202   :  { %3765 = vmatmul.mubr.msk.f32.gmra.mrb[38].mxu1 %vm618_vm3, %v605_v9 }
 0x203   :  { %3767 = vmatprep.mubr.msk.f32.mxu1 %vm618_vm3, %v606_v10 }
 0x206   :  { %3768 = vmatmul.mubr.msk.f32.gmra.mrb[40].mxu1 %vm618_vm3, %v607_v11 }
 0x207   :  { %3770 = vmatprep.mubr.msk.f32.mxu1 %vm618_vm3, %v608_v12 }
 0x20a   :  { %3771 = vmatmul.mubr.msk.f32.gmra.mrb[42].mxu1 %vm618_vm3, %v609_v14 }
 0x20b   :  { %3773 = vmatprep.mubr.msk.f32.mxu1 %vm618_vm3, %v610_v15 }
 0x20e   :  { %3774 = vmatmul.mubr.msk.f32.gmra.mrb[44].mxu1 %vm618_vm3, %v611_v17 }
 0x20f   :  { %3776 = vmatprep.mubr.msk.f32.mxu1 %vm618_vm3, %v612_v18 }
 0x212   :  { %3777 = vmatmul.mubr.msk.f32.gmra.mrb[46].mxu1 %vm618_vm3, %v613_v19 }
 0x28d   :  { %v4517_v35 = vpop.f32.mrb[2].mxu0  ;;  %v4519_v36 = vpop.f32.mrb[2].mxu1 }
 0x28e   :  { %v4521_v37 = vpop.f32.mrb[3].mxu0  ;;  %v4523_v38 = vpop.f32.mrb[3].mxu1 }
 0x291   :  { %v4525_v39 = vpop.f32.mrb[4].mxu0  ;;  %v4527_v40 = vpop.f32.mrb[4].mxu1 }
 0x292   :  { %v4529_v41 = vpop.f32.mrb[5].mxu0  ;;  %v4531_v42 = vpop.f32.mrb[5].mxu1 }
 0x295   :  { %v4533_v43 = vpop.f32.mrb[6].mxu0  ;;  %v4535_v44 = vpop.f32.mrb[6].mxu1 }
 0x296   :  { %v4537_v45 = vpop.f32.mrb[7].mxu0  ;;  %v4539_v46 = vpop.f32.mrb[7].mxu1 }
 0x299   :  { %v4541_v47 = vpop.f32.mrb[8].mxu0  ;;  %v4543_v48 = vpop.f32.mrb[8].mxu1 }
 0x29a   :  { %v4545_v49 = vpop.f32.mrb[9].mxu0  ;;  %v4547_v50 = vpop.f32.mrb[9].mxu1 }
 0x29d   :  { %v4549_v51 = vpop.f32.mrb[10].mxu0  ;;  %v4551_v52 = vpop.f32.mrb[10].mxu1 }
 0x29e   :  { %v4553_v53 = vpop.f32.mrb[11].mxu0  ;;  %v4555_v54 = vpop.f32.mrb[11].mxu1 }
 0x2a1   :  { %v4557_v55 = vpop.f32.mrb[12].mxu0  ;;  %v4559_v56 = vpop.f32.mrb[12].mxu1 }
 0x2a2   :  { %v4561_v57 = vpop.f32.mrb[13].mxu0  ;;  %v4563_v58 = vpop.f32.mrb[13].mxu1 }
 0x2a5   :  { %v4565_v59 = vpop.f32.mrb[14].mxu0  ;;  %v4567_v60 = vpop.f32.mrb[14].mxu1 }
 0x2a6   :  { %v4569_v61 = vpop.f32.mrb[15].mxu0  ;;  %v4571_v62 = vpop.f32.mrb[15].mxu1 }
 0x2a9   :  { %v4578_v0 = vpop.f32.mrb[16].mxu0  ;;  %v3733_v1 = vpop.f32.mrb[16].mxu1 }
 0x2aa   :  { %v791_v2 = vadd.f32 %v3733_v1, %v4576_v63  ;;  %v4581_v3 = vpop.f32.mrb[17].mxu0  ;;  %v785_v4 = vpop.f32.mrb[17].mxu1 }
 0x2ab   :  { %v786_v5 = vadd.f32 %v4576_v63, %v785_v4 }
 0x2ac   :  { %v945_v9 = vmax.f32 %v791_v2, 0.0 }
 0x2ad   :  { %v944_v6 = vmax.f32 %v786_v5, 0.0  ;;  %v4584_v7 = vpop.f32.mrb[18].mxu0  ;;  %v3736_v8 = vpop.f32.mrb[18].mxu1 }
 0x2ae   :  { %v801_v10 = vadd.f32 %v3736_v8, %v4576_v63  ;;  %v4587_v11 = vpop.f32.mrb[19].mxu0  ;;  %v795_v12 = vpop.f32.mrb[19].mxu1 }
 0x2af   :  { %v796_v14 = vadd.f32 %v4576_v63, %v795_v12  ;;  %3795 = vmatprep.mubr.msk.f32.mxu0 %vm980_vm4, %v944_v6 }
 0x2b0   :  { %3796 = vmatmul.mubr.msk.f32.vlgmr.msra.gmra.mrb[20].mxu0 %vm980_vm4, %v945_v9  ;;  %v947_v18 = vmax.f32 %v801_v10, 0.0 }
 0x2b1   :  { %v946_v15 = vmax.f32 %v796_v14, 0.0  ;;  %v3739_v17 = vpop.f32.mrb[20].mxu1 }
 0x2b2   :  { %v811_v19 = vadd.f32 %v3739_v17, %v4576_v63  ;;  %v805_v20 = vpop.f32.mrb[21].mxu1 }
 0x2b3   :  { %v806_v21 = vadd.f32 %v4576_v63, %v805_v20  ;;  %3798 = vmatprep.mubr.msk.f32.mxu0 %vm980_vm4, %v946_v15 }
 0x2b4   :  { %3799 = vmatmul.mubr.msk.f32.gmra.mrb[22].mxu0 %vm980_vm4, %v947_v18  ;;  %v949_v24 = vmax.f32 %v811_v19, 0.0 }
 0x2b5   :  { %v948_v22 = vmax.f32 %v806_v21, 0.0  ;;  %v3742_v23 = vpop.f32.mrb[22].mxu1 }
 0x2b6   :  { %v821_v25 = vadd.f32 %v3742_v23, %v4576_v63  ;;  %v815_v26 = vpop.f32.mrb[23].mxu1 }
 0x2b7   :  { %v816_v27 = vadd.f32 %v4576_v63, %v815_v26  ;;  %3801 = vmatprep.mubr.msk.f32.mxu0 %vm980_vm4, %v948_v22 }
 0x2b8   :  { %3802 = vmatmul.mubr.msk.f32.gmra.mrb[24].mxu0 %vm980_vm4, %v949_v24  ;;  %v951_v30 = vmax.f32 %v821_v25, 0.0 }
 0x2b9   :  { %v950_v28 = vmax.f32 %v816_v27, 0.0  ;;  %v3745_v29 = vpop.f32.mrb[24].mxu1 }
 0x2ba   :  { %v831_v31 = vadd.f32 %v3745_v29, %v4576_v63  ;;  %v825_v32 = vpop.f32.mrb[25].mxu1 }
 0x2bb   :  { %v826_v33 = vadd.f32 %v4576_v63, %v825_v32  ;;  %3804 = vmatprep.mubr.msk.f32.mxu0 %vm980_vm4, %v950_v28 }
 0x2bc   :  { %3805 = vmatmul.mubr.msk.f32.gmra.mrb[26].mxu0 %vm980_vm4, %v951_v30  ;;  %v953_v2 = vmax.f32 %v831_v31, 0.0 }
 0x2bd   :  { %v952_v34 = vmax.f32 %v826_v33, 0.0  ;;  %v3748_v1 = vpop.f32.mrb[26].mxu1 }
 0x2be   :  { %v841_v4 = vadd.f32 %v3748_v1, %v4576_v63  ;;  %v835_v5 = vpop.f32.mrb[27].mxu1 }
 0x2bf   :  { %v836_v6 = vadd.f32 %v4576_v63, %v835_v5  ;;  %3807 = vmatprep.mubr.msk.f32.mxu0 %vm980_vm4, %v952_v34 }
 0x2c0   :  { %3808 = vmatmul.mubr.msk.f32.gmra.mrb[28].mxu0 %vm980_vm4, %v953_v2  ;;  %v955_v10 = vmax.f32 %v841_v4, 0.0 }
 0x2c1   :  { %v954_v8 = vmax.f32 %v836_v6, 0.0  ;;  %v3751_v9 = vpop.f32.mrb[28].mxu1 }
 0x2c2   :  { %v851_v12 = vadd.f32 %v3751_v9, %v4576_v63  ;;  %v845_v14 = vpop.f32.mrb[29].mxu1 }
 0x2c3   :  { %v846_v15 = vadd.f32 %v4576_v63, %v845_v14  ;;  %3810 = vmatprep.mubr.msk.f32.mxu0 %vm980_vm4, %v954_v8 }
 0x2c4   :  { %3811 = vmatmul.mubr.msk.f32.gmra.mrb[30].mxu0 %vm980_vm4, %v955_v10  ;;  %v957_v19 = vmax.f32 %v851_v12, 0.0 }
 0x2c5   :  { %v956_v17 = vmax.f32 %v846_v15, 0.0  ;;  %v3754_v18 = vpop.f32.mrb[30].mxu1 }
 0x2c6   :  { %v861_v20 = vadd.f32 %v3754_v18, %v4576_v63  ;;  %v855_v21 = vpop.f32.mrb[31].mxu1 }
 0x2c7   :  { %v856_v22 = vadd.f32 %v4576_v63, %v855_v21  ;;  %3813 = vmatprep.mubr.msk.f32.mxu0 %vm980_vm4, %v956_v17 }
 0x2c8   :  { %3814 = vmatmul.mubr.msk.f32.gmra.mrb[32].mxu0 %vm980_vm4, %v957_v19  ;;  %v959_v25 = vmax.f32 %v861_v20, 0.0 }
 0x2c9   :  { %v958_v23 = vmax.f32 %v856_v22, 0.0  ;;  %v3757_v24 = vpop.f32.mrb[32].mxu1 }
 0x2ca   :  { %v871_v26 = vadd.f32 %v3757_v24, %v4576_v63  ;;  %v865_v27 = vpop.f32.mrb[33].mxu1 }
 0x2cb   :  { %v866_v28 = vadd.f32 %v4576_v63, %v865_v27  ;;  %3816 = vmatprep.mubr.msk.f32.mxu0 %vm980_vm4, %v958_v23 }
 0x2cc   :  { %3817 = vmatmul.mubr.msk.f32.gmra.mrb[34].mxu0 %vm980_vm4, %v959_v25  ;;  %v961_v31 = vmax.f32 %v871_v26, 0.0 }
 0x2cd   :  { %v960_v29 = vmax.f32 %v866_v28, 0.0  ;;  %v3760_v30 = vpop.f32.mrb[34].mxu1 }
 0x2ce   :  { %v881_v32 = vadd.f32 %v3760_v30, %v4576_v63  ;;  %v875_v33 = vpop.f32.mrb[35].mxu1 }
 0x2cf   :  { %v876_v34 = vadd.f32 %v4576_v63, %v875_v33  ;;  %3819 = vmatprep.mubr.msk.f32.mxu0 %vm980_vm4, %v960_v29 }
 0x2d0   :  { %3820 = vmatmul.mubr.msk.f32.gmra.mrb[36].mxu0 %vm980_vm4, %v961_v31  ;;  %v963_v4 = vmax.f32 %v881_v32, 0.0 }
 0x2d1   :  { %v962_v1 = vmax.f32 %v876_v34, 0.0  ;;  %v3763_v2 = vpop.f32.mrb[36].mxu1 }
 0x2d2   :  { %v891_v5 = vadd.f32 %v3763_v2, %v4576_v63  ;;  %v885_v6 = vpop.f32.mrb[37].mxu1 }
 0x2d3   :  { %v886_v8 = vadd.f32 %v4576_v63, %v885_v6  ;;  %3822 = vmatprep.mubr.msk.f32.mxu0 %vm980_vm4, %v962_v1 }
 0x2d4   :  { %3823 = vmatmul.mubr.msk.f32.gmra.mrb[38].mxu0 %vm980_vm4, %v963_v4  ;;  %v965_v12 = vmax.f32 %v891_v5, 0.0 }
 0x2d5   :  { %v964_v9 = vmax.f32 %v886_v8, 0.0  ;;  %v3766_v10 = vpop.f32.mrb[38].mxu1 }
 0x2d6   :  { %v901_v14 = vadd.f32 %v3766_v10, %v4576_v63  ;;  %v895_v15 = vpop.f32.mrb[39].mxu1 }
 0x2d7   :  { %v896_v17 = vadd.f32 %v4576_v63, %v895_v15  ;;  %3825 = vmatprep.mubr.msk.f32.mxu0 %vm980_vm4, %v964_v9  ;;  %v4655_v15 = vld [vmem:[%s5738_s5 + $0x2] ss:$0 sm:$0xff] }
 0x2d8   :  { %3826 = vmatmul.mubr.msk.f32.gmra.mrb[40].mxu0 %vm980_vm4, %v965_v12  ;;  %v967_v20 = vmax.f32 %v901_v14, 0.0  ;;  %v4650_v14 = vpop.permute.xlu0 %1336 }
 0x2d9   :  { %v966_v18 = vmax.f32 %v896_v17, 0.0  ;;  %v3769_v19 = vpop.f32.mrb[40].mxu1 }
 0x2da   :  { %v911_v21 = vadd.f32 %v3769_v19, %v4576_v63  ;;  %v905_v22 = vpop.f32.mrb[41].mxu1 }
 0x2db   :  { %v906_v23 = vadd.f32 %v4576_v63, %v905_v22  ;;  %3828 = vmatprep.mubr.msk.f32.mxu0 %vm980_vm4, %v966_v18 }
 0x2dc   :  { %3829 = vmatmul.mubr.msk.f32.gmra.mrb[42].mxu0 %vm980_vm4, %v967_v20  ;;  %v969_v26 = vmax.f32 %v911_v21, 0.0  ;;  %v4658_v19 = vpop.permute.xlu0 %1338 }
 0x2dd   :  { %v968_v24 = vmax.f32 %v906_v23, 0.0  ;;  %v3772_v25 = vpop.f32.mrb[42].mxu1  ;;  %v1343_v21 = vsub.f32 %v4517_v35, %v4658_v19  ;;  %v1342_v23 = vsub.f32 %v4521_v37, %v4650_v14  ;;  %v1345_v35 = vsub.f32 %v4525_v39, %v4658_v19 }
 0x2de   :  { %v921_v27 = vadd.f32 %v3772_v25, %v4576_v63  ;;  %v915_v28 = vpop.f32.mrb[43].mxu1  ;;  %v1344_v37 = vsub.f32 %v4529_v41, %v4650_v14  ;;  %v1347_v39 = vsub.f32 %v4533_v43, %v4658_v19  ;;  %v1346_v41 = vsub.f32 %v4537_v45, %v4650_v14 }
 0x2df   :  { %v916_v29 = vadd.f32 %v4576_v63, %v915_v28  ;;  %3831 = vmatprep.mubr.msk.f32.mxu0 %vm980_vm4, %v968_v24  ;;  %v1349_v43 = vsub.f32 %v4541_v47, %v4658_v19  ;;  %v1351_v47 = vsub.f32 %v4549_v51, %v4658_v19  ;;  %v1353_v51 = vsub.f32 %v4557_v55, %v4658_v19 }
 0x2e0   :  { %3832 = vmatmul.mubr.msk.f32.gmra.mrb[44].mxu0 %vm980_vm4, %v969_v26  ;;  %v971_v32 = vmax.f32 %v921_v27, 0.0  ;;  %v1355_v55 = vsub.f32 %v4565_v59, %v4658_v19  ;;  %v1357_v59 = vsub.f32 %v4578_v0, %v4658_v19  ;;  %v39_v0 = vld [vmem:[%s5737_s4 + $0x78] sm:$0xff] }
 0x2e1   :  { %v970_v30 = vmax.f32 %v916_v29, 0.0  ;;  %v3775_v31 = vpop.f32.mrb[44].mxu1 }
 0x2e2   :  { %v931_v33 = vadd.f32 %v3775_v31, %v4576_v63  ;;  %v925_v34 = vpop.f32.mrb[45].mxu1 }
 0x2e3   :  { %v926_v1 = vadd.f32 %v4576_v63, %v925_v34  ;;  %3834 = vmatprep.mubr.msk.f32.mxu0 %vm980_vm4, %v970_v30 }
 0x2e4   :  { %3835 = vmatmul.mubr.msk.f32.gmra.mrb[46].mxu0 %vm980_vm4, %v971_v32  ;;  %v973_v5 = vmax.f32 %v931_v33, 0.0 }
 0x2e5   :  { %v972_v2 = vmax.f32 %v926_v1, 0.0  ;;  %v3778_v4 = vpop.f32.mrb[46].mxu1 }
 0x2e6   :  { %v941_v6 = vadd.f32 %v3778_v4, %v4576_v63  ;;  %v935_v8 = vpop.f32.mrb[47].mxu1 }
 0x2e7   :  { %v936_v9 = vadd.f32 %v4576_v63, %v935_v8  ;;  %3837 = vmatprep.mubr.msk.f32.mxu0 %vm980_vm4, %v972_v2 }
 0x2e8   :  { %3838 = vmatmul.mubr.msk.f32.gmra.mrb[48].mxu0 %vm980_vm4, %v973_v5  ;;  %v975_v12 = vmax.f32 %v941_v6, 0.0 }
 0x2e9   :  { %v974_v10 = vmax.f32 %v936_v9, 0.0 }
 0x2eb   :  { %3840 = vmatprep.mubr.msk.f32.mxu0 %vm980_vm4, %v974_v10 }
 0x2ec   :  { %3841 = vmatmul.mubr.msk.f32.gmra.mrb[50].mxu0 %vm980_vm4, %v975_v12 }
 0x383   :  { %v3797_v17 = vpop.f32.mrb[20].mxu0 }
 0x384   :  { %v1149_v63 = vadd.f32 %v3797_v17, %v4655_v15  ;;  %v1143_v18 = vpop.f32.mrb[21].mxu0 }
 0x385   :  { %v1144_v20 = vadd.f32 %v4655_v15, %v1143_v18 }
 0x386   :  { %v1303_v22 = vmax.f32 %v1149_v63, 0.0 }
 0x387   :  { %v1302_v24 = vmax.f32 %v1144_v20, 0.0  ;;  %v3800_v25 = vpop.f32.mrb[22].mxu0  ;;  %v1348_v20 = vsub.f32 %v4545_v49, %v4650_v14 }
 0x388   :  { %v1375_v26 = vadd.f32 %v1343_v21, %v1303_v22  ;;  %v1159_v27 = vadd.f32 %v3800_v25, %v4655_v15  ;;  %2459 = vrot.lane.b32.xlu1 %v1303_v22, %s4155_s11  ;;  %v1153_v28 = vpop.f32.mrb[23].mxu0 }
 0x389   :  { %v1374_v29 = vadd.f32 %v1342_v23, %v1302_v24  ;;  %v1154_v30 = vadd.f32 %v4655_v15, %v1153_v28  ;;  %2457 = vrot.lane.b32.xlu0 %v1302_v24, %s4155_s11  ;;  %v1350_v28 = vsub.f32 %v4553_v53, %v4650_v14 }
 0x38a   :  { %v1305_v31 = vmax.f32 %v1159_v27, 0.0 }
 0x38b   :  { %v1304_v32 = vmax.f32 %v1154_v30, 0.0  ;;  %v3803_v33 = vpop.f32.mrb[24].mxu0  ;;  %3851 = vmatprep.mubr.msk.f32.mxu1 %vm1410_vm5, %v1374_v29 }
 0x38c   :  { %v1377_v34 = vadd.f32 %v1345_v35, %v1305_v31  ;;  %v1169_v1 = vadd.f32 %v3803_v33, %v4655_v15  ;;  %2463 = vrot.lane.b32.xlu1 %v1305_v31, %s4155_s11  ;;  %v1163_v2 = vpop.f32.mrb[25].mxu0  ;;  %3852 = vmatmul.mubr.msk.f32.vlgmr.msra.gmra.mrb[48].mxu1 %vm1410_vm5, %v1375_v26 }
 0x38d   :  { %v1376_v4 = vadd.f32 %v1344_v37, %v1304_v32  ;;  %v1164_v5 = vadd.f32 %v4655_v15, %v1163_v2 }
 0x38e   :  { %v1307_v6 = vmax.f32 %v1169_v1, 0.0 }
 0x38f   :  { %v1306_v8 = vmax.f32 %v1164_v5, 0.0  ;;  %v3806_v9 = vpop.f32.mrb[26].mxu0  ;;  %3854 = vmatprep.mubr.msk.f32.mxu1 %vm1410_vm5, %v1376_v4 }
 0x390   :  { %v1379_v10 = vadd.f32 %v1347_v39, %v1307_v6  ;;  %v1179_v12 = vadd.f32 %v3806_v9, %v4655_v15  ;;  %v1173_v17 = vpop.f32.mrb[27].mxu0  ;;  %2461 = vrot.lane.b32.xlu1 %v1304_v32, %s4155_s11  ;;  %3855 = vmatmul.mubr.msk.f32.gmra.mrb[50].mxu1 %vm1410_vm5, %v1377_v34  ;;  %v1352_v34 = vsub.f32 %v4561_v57, %v4650_v14 }
 0x391   :  { %v1378_v63 = vadd.f32 %v1346_v41, %v1306_v8  ;;  %v1174_v18 = vadd.f32 %v4655_v15, %v1173_v17  ;;  %2465 = vrot.lane.b32.xlu0 %v1306_v8, %s4155_s11  ;;  %v1354_v8 = vsub.f32 %v4569_v61, %v4650_v14 }
 0x392   :  { %v1309_v45 = vmax.f32 %v1179_v12, 0.0 }
 0x393   :  { %v1308_v21 = vmax.f32 %v1174_v18, 0.0  ;;  %v3809_v22 = vpop.f32.mrb[28].mxu0  ;;  %3857 = vmatprep.mubr.msk.f32.mxu1 %vm1410_vm5, %v1378_v63 }
 0x394   :  { %v1381_v23 = vadd.f32 %v1349_v43, %v1309_v45  ;;  %v1189_v24 = vadd.f32 %v3809_v22, %v4655_v15  ;;  %v1183_v25 = vpop.f32.mrb[29].mxu0  ;;  %2467 = vrot.lane.b32.xlu1 %v1307_v6, %s4155_s11  ;;  %3858 = vmatmul.mubr.msk.f32.gmra.mrb[52].mxu1 %vm1410_vm5, %v1379_v10 }
 0x395   :  { %v1380_v26 = vadd.f32 %v1348_v20, %v1308_v21  ;;  %v1184_v27 = vadd.f32 %v4655_v15, %v1183_v25  ;;  %2469 = vrot.lane.b32.xlu0 %v1308_v21, %s4155_s11 }
 0x396   :  { %v1311_v49 = vmax.f32 %v1189_v24, 0.0 }
 0x397   :  { %v1310_v29 = vmax.f32 %v1184_v27, 0.0  ;;  %v3812_v30 = vpop.f32.mrb[30].mxu0  ;;  %3860 = vmatprep.mubr.msk.f32.mxu1 %vm1410_vm5, %v1380_v26  ;;  %v1359_v27 = vsub.f32 %v4584_v7, %v4658_v19 }
 0x398   :  { %v1383_v35 = vadd.f32 %v1351_v47, %v1311_v49  ;;  %v1199_v31 = vadd.f32 %v3812_v30, %v4655_v15  ;;  %v1193_v37 = vpop.f32.mrb[31].mxu0  ;;  %2471 = vrot.lane.b32.xlu1 %v1309_v45, %s4155_s11  ;;  %3861 = vmatmul.mubr.msk.f32.gmra.mrb[54].mxu1 %vm1410_vm5, %v1381_v23  ;;  %v1356_v45 = vsub.f32 %v4581_v3, %v4650_v14  ;;  %v40_v3 = vld [vmem:[%s5737_s4 + $0x80] sm:$0xff] }
 0x399   :  { %v1382_v32 = vadd.f32 %v1350_v28, %v1310_v29  ;;  %v1194_v33 = vadd.f32 %v4655_v15, %v1193_v37  ;;  %2473 = vrot.lane.b32.xlu0 %v1310_v29, %s4155_s11  ;;  %v1358_v28 = vsub.f32 %v4587_v11, %v4650_v14  ;;  %v1361_v11 = vsub.f32 %v4519_v36, %v4658_v19 }
 0x39a   :  { %v1313_v53 = vmax.f32 %v1199_v31, 0.0 }
 0x39b   :  { %v1312_v1 = vmax.f32 %v1194_v33, 0.0  ;;  %v3815_v2 = vpop.f32.mrb[32].mxu0  ;;  %3863 = vmatprep.mubr.msk.f32.mxu1 %vm1410_vm5, %v1382_v32 }
 0x39c   :  { %v1385_v4 = vadd.f32 %v1353_v51, %v1313_v53  ;;  %v1209_v5 = vadd.f32 %v3815_v2, %v4655_v15  ;;  %v1203_v39 = vpop.f32.mrb[33].mxu0  ;;  %2475 = vrot.lane.b32.xlu1 %v1311_v49, %s4155_s11  ;;  %3864 = vmatmul.mubr.msk.f32.gmra.mrb[56].mxu1 %vm1410_vm5, %v1383_v35  ;;  %v4002_v49 = vpack.c.bf16 %v40_v3, %v39_v0 }
 0x39d   :  { %v1384_v6 = vadd.f32 %v1352_v34, %v1312_v1  ;;  %v1204_v41 = vadd.f32 %v4655_v15, %v1203_v39  ;;  %2477 = vrot.lane.b32.xlu0 %v1312_v1, %s4155_s11  ;;  %v1360_v51 = vsub.f32 %v4523_v38, %v4650_v14  ;;  %v1363_v38 = vsub.f32 %v4527_v40, %v4658_v19 }
 0x39e   :  { %v1315_v57 = vmax.f32 %v1209_v5, 0.0  ;;  %4003 = vmatprep.subr.bf16.mxu0 %v4002_v49  ;;  %v1365_v40 = vsub.f32 %v4535_v44, %v4658_v19  ;;  %v41_v44 = vld [vmem:[%s5737_s4 + $0x88] sm:$0xff] }
 0x39f   :  { %v1314_v9 = vmax.f32 %v1204_v41, 0.0  ;;  %v3818_v10 = vpop.f32.mrb[34].mxu0  ;;  %3866 = vmatprep.mubr.msk.f32.mxu1 %vm1410_vm5, %v1384_v6  ;;  %4005 = vmatpush3.bf16.msra.mxu0 %v4002_v49  ;;  %v1362_v6 = vsub.f32 %v4531_v42, %v4650_v14 }
 0x3a0   :  { %v1387_v12 = vadd.f32 %v1355_v55, %v1315_v57  ;;  %v1219_v17 = vadd.f32 %v3818_v10, %v4655_v15  ;;  %v1213_v63 = vpop.f32.mrb[35].mxu0  ;;  %2479 = vrot.lane.b32.xlu1 %v1313_v53, %s4155_s11  ;;  %3867 = vmatmul.mubr.msk.f32.gmra.mrb[58].mxu1 %vm1410_vm5, %v1385_v4 }
 0x3a1   :  { %v1386_v18 = vadd.f32 %v1354_v8, %v1314_v9  ;;  %v1214_v43 = vadd.f32 %v4655_v15, %v1213_v63  ;;  %2481 = vrot.lane.b32.xlu0 %v1314_v9, %s4155_s11 }
 0x3a2   :  { %v1317_v61 = vmax.f32 %v1219_v17, 0.0  ;;  %v1364_v17 = vsub.f32 %v4539_v46, %v4650_v14  ;;  %v42_v46 = vld [vmem:[%s5737_s4 + $0x90] sm:$0xff] }
 0x3a3   :  { %v1316_v20 = vmax.f32 %v1214_v43, 0.0  ;;  %v3821_v21 = vpop.f32.mrb[36].mxu0  ;;  %3869 = vmatprep.mubr.msk.f32.mxu1 %vm1410_vm5, %v1386_v18 }
 0x3a4   :  { %v1389_v22 = vadd.f32 %v1357_v59, %v1317_v61  ;;  %v1229_v23 = vadd.f32 %v3821_v21, %v4655_v15  ;;  %v1223_v24 = vpop.f32.mrb[37].mxu0  ;;  %2483 = vrot.lane.b32.xlu1 %v1315_v57, %s4155_s11  ;;  %3870 = vmatmul.mubr.msk.f32.gmra.mrb[60].mxu1 %vm1410_vm5, %v1387_v12  ;;  %v1367_v21 = vsub.f32 %v4543_v48, %v4658_v19 }
 0x3a5   :  { %v1388_v25 = vadd.f32 %v1356_v45, %v1316_v20  ;;  %v1224_v26 = vadd.f32 %v4655_v15, %v1223_v24  ;;  %2485 = vrot.lane.b32.xlu0 %v1316_v20, %s4155_s11  ;;  %v1366_v24 = vsub.f32 %v4547_v50, %v4650_v14  ;;  %v1369_v50 = vsub.f32 %v4551_v52, %v4658_v19 }
 0x3a6   :  { %v1319_v47 = vmax.f32 %v1229_v23, 0.0  ;;  %v4006_v23 = vpack.c.bf16 %v42_v46, %v41_v44 }
 0x3a7   :  { %v1318_v29 = vmax.f32 %v1224_v26, 0.0  ;;  %v3824_v30 = vpop.f32.mrb[38].mxu0  ;;  %3872 = vmatprep.mubr.msk.f32.mxu1 %vm1410_vm5, %v1388_v25 }
 0x3a8   :  { %v1391_v35 = vadd.f32 %v1359_v27, %v1319_v47  ;;  %v1239_v31 = vadd.f32 %v3824_v30, %v4655_v15  ;;  %v1233_v37 = vpop.f32.mrb[39].mxu0  ;;  %2487 = vrot.lane.b32.xlu1 %v1317_v61, %s4155_s11  ;;  %3873 = vmatmul.mubr.msk.f32.gmra.mrb[62].mxu1 %vm1410_vm5, %v1389_v22 }
 0x3a9   :  { %v1390_v32 = vadd.f32 %v1358_v28, %v1318_v29  ;;  %v1234_v7 = vadd.f32 %v4655_v15, %v1233_v37  ;;  %2489 = vrot.lane.b32.xlu0 %v1318_v29, %s4155_s11  ;;  %4007 = vmatprep.subr.bf16.mxu0 %v4006_v23  ;;  %v1368_v28 = vsub.f32 %v4555_v54, %v4650_v14  ;;  %v43_v54 = vld [vmem:[%s5737_s4 + $0x98] sm:$0xff] }
 0x3aa   :  { %v1321_v33 = vmax.f32 %v1239_v31, 0.0  ;;  %4009 = vmatpush3.bf16.msra.mxu0 %v4006_v23 }
 0x3ab   :  { %v1320_v53 = vmax.f32 %v1234_v7, 0.0  ;;  %v3827_v34 = vpop.f32.mrb[40].mxu0  ;;  %3875 = vmatprep.mubr.msk.f32.mxu1 %vm1410_vm5, %v1390_v32  ;;  %v44_v7 = vld [vmem:[%s5737_s4 + $0xa0] sm:$0xff] }
 0x3ac   :  { %v1393_v1 = vadd.f32 %v1361_v11, %v1321_v33  ;;  %v1249_v2 = vadd.f32 %v3827_v34, %v4655_v15  ;;  %v1243_v4 = vpop.f32.mrb[41].mxu0  ;;  %2491 = vrot.lane.b32.xlu1 %v1319_v47, %s4155_s11  ;;  %3876 = vmatmul.mubr.msk.f32.gmra.mrb[64].mxu1 %vm1410_vm5, %v1391_v35  ;;  %v45_v11 = vld [vmem:[%s5737_s4 + $0xa8] sm:$0xff]  ;;  %v46_v34 = vld [vmem:[%s5737_s4 + $0xb0] sm:$0xff] }
 0x3ad   :  { %v1392_v5 = vadd.f32 %v1360_v51, %v1320_v53  ;;  %v1244_v36 = vadd.f32 %v4655_v15, %v1243_v4  ;;  %2493 = vrot.lane.b32.xlu0 %v1320_v53, %s4155_s11  ;;  %v4010_v53 = vpack.c.bf16 %v44_v7, %v43_v54 }
 0x3ae   :  { %v1323_v39 = vmax.f32 %v1249_v2, 0.0 }
 0x3af   :  { %v1322_v41 = vmax.f32 %v1244_v36, 0.0  ;;  %v3830_v55 = vpop.f32.mrb[42].mxu0  ;;  %3878 = vmatprep.mubr.msk.f32.mxu1 %vm1410_vm5, %v1392_v5  ;;  %v4014_v5 = vpack.c.bf16 %v46_v34, %v45_v11  ;;  %4011 = vmatprep.subr.bf16.mxu0 %v4010_v53 }
 0x3b0   :  { %v1395_v57 = vadd.f32 %v1363_v38, %v1323_v39  ;;  %v1259_v8 = vadd.f32 %v3830_v55, %v4655_v15  ;;  %v1253_v9 = vpop.f32.mrb[43].mxu0  ;;  %2495 = vrot.lane.b32.xlu1 %v1321_v33, %s4155_s11  ;;  %3879 = vmatmul.mubr.msk.f32.gmra.mrb[66].mxu1 %vm1410_vm5, %v1393_v1  ;;  %v1371_v33 = vsub.f32 %v4559_v56, %v4658_v19 }
 0x3b1   :  { %v1394_v10 = vadd.f32 %v1362_v6, %v1322_v41  ;;  %v1254_v12 = vadd.f32 %v4655_v15, %v1253_v9  ;;  %2497 = vrot.lane.b32.xlu0 %v1322_v41, %s4155_s11  ;;  %v1370_v1 = vsub.f32 %v4563_v58, %v4650_v14  ;;  %v1373_v58 = vsub.f32 %v4567_v60, %v4658_v19 }
 0x3b2   :  { %v1325_v42 = vmax.f32 %v1259_v8, 0.0  ;;  %4013 = vmatpush3.bf16.msra.mxu0 %v4010_v53  ;;  %v1372_v55 = vsub.f32 %v4571_v62, %v4650_v14 }
 0x3b3   :  { %v1324_v63 = vmax.f32 %v1254_v12, 0.0  ;;  %v3833_v18 = vpop.f32.mrb[44].mxu0  ;;  %3881 = vmatprep.mubr.msk.f32.mxu1 %vm1410_vm5, %v1394_v10  ;;  %4015 = vmatprep.subr.bf16.mxu0 %v4014_v5 }
 0x3b4   :  { %v1397_v43 = vadd.f32 %v1365_v40, %v1325_v42  ;;  %v1269_v59 = vadd.f32 %v3833_v18, %v4655_v15  ;;  %v1263_v61 = vpop.f32.mrb[45].mxu0  ;;  %2499 = vrot.lane.b32.xlu1 %v1323_v39, %s4155_s11  ;;  %3882 = vmatmul.mubr.msk.f32.gmra.mrb[68].mxu1 %vm1410_vm5, %v1395_v57 }
 0x3b5   :  { %v1396_v45 = vadd.f32 %v1364_v17, %v1324_v63  ;;  %v1264_v20 = vadd.f32 %v4655_v15, %v1263_v61  ;;  %2501 = vrot.lane.b32.xlu0 %v1324_v63, %s4155_s11 }
 0x3b6   :  { %v1327_v22 = vmax.f32 %v1269_v59, 0.0  ;;  %4017 = vmatpush3.bf16.msra.mxu0 %v4014_v5 }
 0x3b7   :  { %v1326_v25 = vmax.f32 %v1264_v20, 0.0  ;;  %v3836_v26 = vpop.f32.mrb[46].mxu0  ;;  %3884 = vmatprep.mubr.msk.f32.mxu1 %vm1410_vm5, %v1396_v45 }
 0x3b8   :  { %v1399_v0 = vadd.f32 %v1367_v21, %v1327_v22  ;;  %v1279_v3 = vadd.f32 %v3836_v26, %v4655_v15  ;;  %v1273_v27 = vpop.f32.mrb[47].mxu0  ;;  %2503 = vrot.lane.b32.xlu1 %v1325_v42, %s4155_s11  ;;  %3885 = vmatmul.mubr.msk.f32.gmra.mrb[70].mxu1 %vm1410_vm5, %v1397_v43 }
 0x3b9   :  { %v1398_v47 = vadd.f32 %v1366_v24, %v1326_v25  ;;  %v1274_v48 = vadd.f32 %v4655_v15, %v1273_v27  ;;  %2505 = vrot.lane.b32.xlu0 %v1326_v25, %s4155_s11 }
 0x3ba   :  { %v1329_v49 = vmax.f32 %v1279_v3, 0.0 }
 0x3bb   :  { %v1328_v29 = vmax.f32 %v1274_v48, 0.0  ;;  %v3839_v30 = vpop.f32.mrb[48].mxu0  ;;  %3887 = vmatprep.mubr.msk.f32.mxu1 %vm1410_vm5, %v1398_v47 }
 0x3bc   :  { %v1401_v35 = vadd.f32 %v1369_v50, %v1329_v49  ;;  %v1289_v31 = vadd.f32 %v3839_v30, %v4655_v15  ;;  %v1283_v37 = vpop.f32.mrb[49].mxu0  ;;  %2507 = vrot.lane.b32.xlu1 %v1327_v22, %s4155_s11  ;;  %3888 = vmatmul.mubr.msk.f32.gmra.mrb[72].mxu1 %vm1410_vm5, %v1399_v0 }
 0x3bd   :  { %v1400_v32 = vadd.f32 %v1368_v28, %v1328_v29  ;;  %v1284_v52 = vadd.f32 %v4655_v15, %v1283_v37  ;;  %2509 = vrot.lane.b32.xlu0 %v1328_v29, %s4155_s11 }
 0x3be   :  { %v1331_v51 = vmax.f32 %v1289_v31, 0.0 }
 0x3bf   :  { %v1330_v2 = vmax.f32 %v1284_v52, 0.0  ;;  %v3842_v4 = vpop.f32.mrb[50].mxu0  ;;  %3890 = vmatprep.mubr.msk.f32.mxu1 %vm1410_vm5, %v1400_v32 }
 0x3c0   :  { %v1403_v36 = vadd.f32 %v1371_v33, %v1331_v51  ;;  %v1299_v38 = vadd.f32 %v3842_v4, %v4655_v15  ;;  %v1293_v39 = vpop.f32.mrb[51].mxu0  ;;  %2511 = vrot.lane.b32.xlu1 %v1329_v49, %s4155_s11  ;;  %3891 = vmatmul.mubr.msk.f32.gmra.mrb[74].mxu1 %vm1410_vm5, %v1401_v35 }
 0x3c1   :  { %v1402_v56 = vadd.f32 %v1370_v1, %v1330_v2  ;;  %v1294_v6 = vadd.f32 %v4655_v15, %v1293_v39  ;;  %2513 = vrot.lane.b32.xlu0 %v1330_v2, %s4155_s11 }
 0x3c2   :  { %v1333_v41 = vmax.f32 %v1299_v38, 0.0 }
 0x3c3   :  { %v1332_v57 = vmax.f32 %v1294_v6, 0.0  ;;  %3893 = vmatprep.mubr.msk.f32.mxu1 %vm1410_vm5, %v1402_v56 }
 0x3c4   :  { %v1405_v8 = vadd.f32 %v1373_v58, %v1333_v41  ;;  %2515 = vrot.lane.b32.xlu1 %v1331_v51, %s4155_s11  ;;  %3894 = vmatmul.mubr.msk.f32.gmra.mrb[76].mxu1 %vm1410_vm5, %v1403_v36 }
 0x3c5   :  { %v1404_v15 = vadd.f32 %v1372_v55, %v1332_v57  ;;  %2517 = vrot.lane.b32.xlu0 %v1332_v57, %s4155_s11 }
 0x3c7   :  { %3896 = vmatprep.mubr.msk.f32.mxu1 %vm1410_vm5, %v1404_v15 }
 0x3c8   :  { %2519 = vrot.lane.b32.xlu1 %v1333_v41, %s4155_s11  ;;  %3897 = vmatmul.mubr.msk.f32.gmra.mrb[78].mxu1 %vm1410_vm5, %v1405_v8 }
 0x3fa   :  { %v2460_v60 = vpop.permute.xlu1 %2459 }
 0x3fb   :  { %v2554_v62 = vadd.f32 %v4222_v13, %v2460_v60  ;;  %v2458_v14 = vpop.permute.xlu0 %2457 }
 0x3fc   :  { %v2553_v19 = vadd.f32 %v2458_v14, %v4230_v16  ;;  %v4910_v14 = vld [vmem:[%s5738_s5 + $0x3] ss:$0 sm:$0xff] }
 0x3fd   :  { %2619 = vrot.lane.b32.xlu1 %v2554_v62, %s4156_s26 }
 0x3fe   :  { %v2464_v9 = vpop.permute.xlu1 %2463  ;;  %2617 = vrot.lane.b32.xlu0 %v2553_v19, %s4156_s26 }
 0x3ff   :  { %v2556_v10 = vadd.f32 %v4222_v13, %v2464_v9 }
 0x401   :  { %2623 = vrot.lane.b32.xlu1 %v2556_v10, %s4156_s26 }
 0x402   :  { %v2462_v12 = vpop.permute.xlu1 %2461 }
 0x403   :  { %v2555_v40 = vadd.f32 %v2462_v12, %v4230_v16  ;;  %v2466_v42 = vpop.permute.xlu0 %2465 }
 0x404   :  { %v2557_v63 = vadd.f32 %v2466_v42, %v4230_v16 }
 0x405   :  { %2621 = vrot.lane.b32.xlu0 %v2555_v40, %s4156_s26 }
 0x406   :  { %v2468_v17 = vpop.permute.xlu1 %2467 }
 0x407   :  { %v2558_v18 = vadd.f32 %v4222_v13, %v2468_v17  ;;  %v2470_v43 = vpop.permute.xlu0 %2469 }
 0x408   :  { %v2559_v61 = vadd.f32 %v2470_v43, %v4230_v16 }
 0x409   :  { %2627 = vrot.lane.b32.xlu1 %v2558_v18, %s4156_s26  ;;  %2625 = vrot.lane.b32.xlu0 %v2557_v63, %s4156_s26 }
 0x40a   :  { %v2472_v59 = vpop.permute.xlu1 %2471 }
 0x40b   :  { %v2560_v45 = vadd.f32 %v4222_v13, %v2472_v59  ;;  %v2474_v20 = vpop.permute.xlu0 %2473 }
 0x40c   :  { %v2561_v46 = vadd.f32 %v2474_v20, %v4230_v16 }
 0x40d   :  { %2631 = vrot.lane.b32.xlu1 %v2560_v45, %s4156_s26  ;;  %2629 = vrot.lane.b32.xlu0 %v2559_v61, %s4156_s26 }
 0x40e   :  { %v2476_v44 = vpop.permute.xlu1 %2475 }
 0x40f   :  { %v2562_v21 = vadd.f32 %v4222_v13, %v2476_v44  ;;  %v2478_v22 = vpop.permute.xlu0 %2477 }
 0x410   :  { %v2563_v24 = vadd.f32 %v2478_v22, %v4230_v16 }
 0x411   :  { %2635 = vrot.lane.b32.xlu1 %v2562_v21, %s4156_s26  ;;  %2633 = vrot.lane.b32.xlu0 %v2561_v46, %s4156_s26 }
 0x412   :  { %v2480_v23 = vpop.permute.xlu1 %2479 }
 0x413   :  { %v2564_v25 = vadd.f32 %v4222_v13, %v2480_v23  ;;  %v2482_v26 = vpop.permute.xlu0 %2481 }
 0x414   :  { %v2565_v3 = vadd.f32 %v2482_v26, %v4230_v16 }
 0x415   :  { %2639 = vrot.lane.b32.xlu1 %v2564_v25, %s4156_s26  ;;  %2637 = vrot.lane.b32.xlu0 %v2563_v24, %s4156_s26 }
 0x416   :  { %v2484_v0 = vpop.permute.xlu1 %2483 }
 0x417   :  { %v2566_v27 = vadd.f32 %v4222_v13, %v2484_v0  ;;  %v2486_v47 = vpop.permute.xlu0 %2485 }
 0x418   :  { %v2567_v50 = vadd.f32 %v2486_v47, %v4230_v16 }
 0x419   :  { %2643 = vrot.lane.b32.xlu1 %v2566_v27, %s4156_s26  ;;  %2641 = vrot.lane.b32.xlu0 %v2565_v3, %s4156_s26 }
 0x41a   :  { %v2488_v48 = vpop.permute.xlu1 %2487 }
 0x41b   :  { %v2568_v49 = vadd.f32 %v4222_v13, %v2488_v48  ;;  %v2490_v28 = vpop.permute.xlu0 %2489 }
 0x41c   :  { %v2569_v30 = vadd.f32 %v2490_v28, %v4230_v16 }
 0x41d   :  { %2647 = vrot.lane.b32.xlu1 %v2568_v49, %s4156_s26  ;;  %2645 = vrot.lane.b32.xlu0 %v2567_v50, %s4156_s26 }
 0x41e   :  { %v2492_v29 = vpop.permute.xlu1 %2491 }
 0x41f   :  { %v2570_v35 = vadd.f32 %v4222_v13, %v2492_v29  ;;  %v2494_v31 = vpop.permute.xlu0 %2493 }
 0x420   :  { %v2571_v32 = vadd.f32 %v2494_v31, %v4230_v16 }
 0x421   :  { %2651 = vrot.lane.b32.xlu1 %v2570_v35, %s4156_s26  ;;  %2649 = vrot.lane.b32.xlu0 %v2569_v30, %s4156_s26 }
 0x422   :  { %v2496_v37 = vpop.permute.xlu1 %2495 }
 0x423   :  { %v2572_v52 = vadd.f32 %v4222_v13, %v2496_v37  ;;  %v2498_v54 = vpop.permute.xlu0 %2497 }
 0x424   :  { %v2573_v11 = vadd.f32 %v2498_v54, %v4230_v16 }
 0x425   :  { %2655 = vrot.lane.b32.xlu1 %v2572_v52, %s4156_s26  ;;  %2653 = vrot.lane.b32.xlu0 %v2571_v32, %s4156_s26 }
 0x426   :  { %v2500_v7 = vpop.permute.xlu1 %2499 }
 0x427   :  { %v2574_v33 = vadd.f32 %v4222_v13, %v2500_v7  ;;  %v2502_v51 = vpop.permute.xlu0 %2501 }
 0x428   :  { %v2575_v34 = vadd.f32 %v2502_v51, %v4230_v16 }
 0x429   :  { %2659 = vrot.lane.b32.xlu1 %v2574_v33, %s4156_s26  ;;  %2657 = vrot.lane.b32.xlu0 %v2573_v11, %s4156_s26 }
 0x42a   :  { %v2504_v53 = vpop.permute.xlu1 %2503 }
 0x42b   :  { %v2576_v1 = vadd.f32 %v4222_v13, %v2504_v53  ;;  %v2506_v2 = vpop.permute.xlu0 %2505 }
 0x42c   :  { %v2577_v5 = vadd.f32 %v2506_v2, %v4230_v16 }
 0x42d   :  { %2663 = vrot.lane.b32.xlu1 %v2576_v1, %s4156_s26  ;;  %2661 = vrot.lane.b32.xlu0 %v2575_v34, %s4156_s26 }
 0x42e   :  { %v2508_v4 = vpop.permute.xlu1 %2507 }
 0x42f   :  { %v2578_v36 = vadd.f32 %v4222_v13, %v2508_v4  ;;  %v2510_v38 = vpop.permute.xlu0 %2509 }
 0x430   :  { %v2579_v56 = vadd.f32 %v2510_v38, %v4230_v16 }
 0x431   :  { %2667 = vrot.lane.b32.xlu1 %v2578_v36, %s4156_s26  ;;  %2665 = vrot.lane.b32.xlu0 %v2577_v5, %s4156_s26 }
 0x432   :  { %v2512_v39 = vpop.permute.xlu1 %2511 }
 0x433   :  { %v2580_v6 = vadd.f32 %v4222_v13, %v2512_v39  ;;  %v2514_v58 = vpop.permute.xlu0 %2513 }
 0x434   :  { %v2581_v55 = vadd.f32 %v2514_v58, %v4230_v16 }
 0x435   :  { %2671 = vrot.lane.b32.xlu1 %v2580_v6, %s4156_s26  ;;  %2669 = vrot.lane.b32.xlu0 %v2579_v56, %s4156_s26 }
 0x436   :  { %v2516_v41 = vpop.permute.xlu1 %2515 }
 0x437   :  { %v2582_v57 = vadd.f32 %v4222_v13, %v2516_v41  ;;  %v2518_v8 = vpop.permute.xlu0 %2517 }
 0x438   :  { %v2583_v60 = vadd.f32 %v2518_v8, %v4230_v16 }
 0x439   :  { %2675 = vrot.lane.b32.xlu1 %v2582_v57, %s4156_s26  ;;  %2673 = vrot.lane.b32.xlu0 %v2581_v55, %s4156_s26 }
 0x43a   :  { %v2520_v15 = vpop.permute.xlu1 %2519 }
 0x43b   :  { %v2584_v62 = vadd.f32 %v4222_v13, %v2520_v15 }
 0x43d   :  { %2679 = vrot.lane.b32.xlu1 %v2584_v62, %s4156_s26  ;;  %2677 = vrot.lane.b32.xlu0 %v2583_v60, %s4156_s26 }
 0x45f   :  { %v3853_v19 = vpop.f32.mrb[48].mxu1 }
 0x460   :  { %v1579_v9 = vadd.f32 %v3853_v19, %v4910_v14  ;;  %v1573_v10 = vpop.f32.mrb[49].mxu1 }
 0x461   :  { %v1574_v12 = vadd.f32 %v4910_v14, %v1573_v10 }
 0x462   :  { %v1733_v16 = vmax.f32 %v1579_v9, 0.0 }
 0x463   :  { %v1732_v40 = vmax.f32 %v1574_v12, 0.0  ;;  %v3856_v42 = vpop.f32.mrb[50].mxu1 }
 0x464   :  { %v1589_v13 = vadd.f32 %v3856_v42, %v4910_v14  ;;  %v1583_v17 = vpop.f32.mrb[51].mxu1 }
 0x465   :  { %v1584_v63 = vadd.f32 %v4910_v14, %v1583_v17  ;;  %3915 = vmatprep.mubr.msk.f32.mxu0 %vm980_vm4, %v1732_v40 }
 0x466   :  { %3916 = vmatmul.mubr.msk.f32.vlgmr.msra.gmra.mrb[52].mxu0 %vm980_vm4, %v1733_v16  ;;  %v1735_v59 = vmax.f32 %v1589_v13, 0.0 }
 0x467   :  { %v1734_v18 = vmax.f32 %v1584_v63, 0.0  ;;  %v3859_v43 = vpop.f32.mrb[52].mxu1 }
 0x468   :  { %v1599_v61 = vadd.f32 %v3859_v43, %v4910_v14  ;;  %v1593_v45 = vpop.f32.mrb[53].mxu1 }
 0x469   :  { %v1594_v20 = vadd.f32 %v4910_v14, %v1593_v45  ;;  %3918 = vmatprep.mubr.msk.f32.mxu0 %vm980_vm4, %v1734_v18 }
 0x46a   :  { %3919 = vmatmul.mubr.msk.f32.gmra.mrb[54].mxu0 %vm980_vm4, %v1735_v59  ;;  %v1737_v21 = vmax.f32 %v1599_v61, 0.0 }
 0x46b   :  { %v1736_v44 = vmax.f32 %v1594_v20, 0.0  ;;  %v3862_v46 = vpop.f32.mrb[54].mxu1 }
 0x46c   :  { %v1609_v22 = vadd.f32 %v3862_v46, %v4910_v14  ;;  %v1603_v23 = vpop.f32.mrb[55].mxu1 }
 0x46d   :  { %v1604_v24 = vadd.f32 %v4910_v14, %v1603_v23  ;;  %3921 = vmatprep.mubr.msk.f32.mxu0 %vm980_vm4, %v1736_v44 }
 0x46e   :  { %3922 = vmatmul.mubr.msk.f32.gmra.mrb[56].mxu0 %vm980_vm4, %v1737_v21  ;;  %v1739_v0 = vmax.f32 %v1609_v22, 0.0 }
 0x46f   :  { %v1738_v25 = vmax.f32 %v1604_v24, 0.0  ;;  %v3865_v26 = vpop.f32.mrb[56].mxu1 }
 0x470   :  { %v1619_v3 = vadd.f32 %v3865_v26, %v4910_v14  ;;  %v1613_v27 = vpop.f32.mrb[57].mxu1 }
 0x471   :  { %v1614_v47 = vadd.f32 %v4910_v14, %v1613_v27  ;;  %3924 = vmatprep.mubr.msk.f32.mxu0 %vm980_vm4, %v1738_v25 }
 0x472   :  { %3925 = vmatmul.mubr.msk.f32.gmra.mrb[58].mxu0 %vm980_vm4, %v1739_v0  ;;  %v1741_v49 = vmax.f32 %v1619_v3, 0.0 }
 0x473   :  { %v1740_v48 = vmax.f32 %v1614_v47, 0.0  ;;  %v3868_v50 = vpop.f32.mrb[58].mxu1 }
 0x474   :  { %v1629_v28 = vadd.f32 %v3868_v50, %v4910_v14  ;;  %v1623_v29 = vpop.f32.mrb[59].mxu1 }
 0x475   :  { %v1624_v30 = vadd.f32 %v4910_v14, %v1623_v29  ;;  %3927 = vmatprep.mubr.msk.f32.mxu0 %vm980_vm4, %v1740_v48 }
 0x476   :  { %3928 = vmatmul.mubr.msk.f32.gmra.mrb[60].mxu0 %vm980_vm4, %v1741_v49  ;;  %v1743_v37 = vmax.f32 %v1629_v28, 0.0 }
 0x477   :  { %v1742_v35 = vmax.f32 %v1624_v30, 0.0  ;;  %v3871_v31 = vpop.f32.mrb[60].mxu1  ;;  %v4979_v30 = vld [vmem:[%s5738_s5 + $0x4] ss:$0 sm:$0xff] }
 0x478   :  { %v1639_v32 = vadd.f32 %v3871_v31, %v4910_v14  ;;  %v1633_v52 = vpop.f32.mrb[61].mxu1 }
 0x479   :  { %v1634_v54 = vadd.f32 %v4910_v14, %v1633_v52  ;;  %3930 = vmatprep.mubr.msk.f32.mxu0 %vm980_vm4, %v1742_v35 }
 0x47a   :  { %3931 = vmatmul.mubr.msk.f32.gmra.mrb[62].mxu0 %vm980_vm4, %v1743_v37  ;;  %v1745_v11 = vmax.f32 %v1639_v32, 0.0 }
 0x47b   :  { %v1744_v7 = vmax.f32 %v1634_v54, 0.0  ;;  %v3874_v33 = vpop.f32.mrb[62].mxu1  ;;  %v2121_v54 = vld [vmem:[%s5735_s2] sm:$0xff] }
 0x47c   :  { %v1649_v51 = vadd.f32 %v3874_v33, %v4910_v14  ;;  %v1643_v53 = vpop.f32.mrb[63].mxu1 }
 0x47d   :  { %3933 = vmatprep.mubr.msk.f32.mxu0 %vm980_vm4, %v1744_v7  ;;  %v1644_v34 = vadd.f32 %v4910_v14, %v1643_v53 }
 0x47e   :  { %3934 = vmatmul.mubr.msk.f32.gmra.mrb[64].mxu0 %vm980_vm4, %v1745_v11  ;;  %v1747_v4 = vmax.f32 %v1649_v51, 0.0 }
 0x47f   :  { %v1746_v1 = vmax.f32 %v1644_v34, 0.0  ;;  %v3877_v2 = vpop.f32.mrb[64].mxu1 }
 0x480   :  { %v1659_v5 = vadd.f32 %v3877_v2, %v4910_v14  ;;  %v1653_v36 = vpop.f32.mrb[65].mxu1 }
 0x481   :  { %v1654_v38 = vadd.f32 %v4910_v14, %v1653_v36  ;;  %3936 = vmatprep.mubr.msk.f32.mxu0 %vm980_vm4, %v1746_v1  ;;  %v2124_v1 = vld [vmem:[%s5735_s2 + $0x18] sm:$0xff]  ;;  %v2123_v36 = vld [vmem:[%s5735_s2 + $0x10] sm:$0xff] }
 0x482   :  { %3937 = vmatmul.mubr.msk.f32.gmra.mrb[66].mxu0 %vm980_vm4, %v1747_v4  ;;  %v1749_v6 = vmax.f32 %v1659_v5, 0.0 }
 0x483   :  { %v1748_v39 = vmax.f32 %v1654_v38, 0.0  ;;  %v3880_v56 = vpop.f32.mrb[66].mxu1 }
 0x484   :  { %v1669_v58 = vadd.f32 %v3880_v56, %v4910_v14  ;;  %v1663_v41 = vpop.f32.mrb[67].mxu1 }
 0x485   :  { %v1664_v55 = vadd.f32 %v4910_v14, %v1663_v41  ;;  %3939 = vmatprep.mubr.msk.f32.mxu0 %vm980_vm4, %v1748_v39 }
 0x486   :  { %3940 = vmatmul.mubr.msk.f32.gmra.mrb[68].mxu0 %vm980_vm4, %v1749_v6  ;;  %v1751_v15 = vmax.f32 %v1669_v58, 0.0 }
 0x487   :  { %v1750_v57 = vmax.f32 %v1664_v55, 0.0  ;;  %v3883_v8 = vpop.f32.mrb[68].mxu1 }
 0x488   :  { %v1679_v60 = vadd.f32 %v3883_v8, %v4910_v14  ;;  %v1673_v62 = vpop.f32.mrb[69].mxu1  ;;  %v2126_v8 = vld [vmem:[%s5735_s2 + $0x28] sm:$0xff] }
 0x489   :  { %v1674_v19 = vadd.f32 %v4910_v14, %v1673_v62  ;;  %3942 = vmatprep.mubr.msk.f32.mxu0 %vm980_vm4, %v1750_v57 }
 0x48a   :  { %3943 = vmatmul.mubr.msk.f32.gmra.mrb[70].mxu0 %vm980_vm4, %v1751_v15  ;;  %v1753_v12 = vmax.f32 %v1679_v60, 0.0 }
 0x48b   :  { %v1752_v9 = vmax.f32 %v1674_v19, 0.0  ;;  %v3886_v10 = vpop.f32.mrb[70].mxu1 }
 0x48c   :  { %v1689_v40 = vadd.f32 %v3886_v10, %v4910_v14  ;;  %v1683_v42 = vpop.f32.mrb[71].mxu1 }
 0x48d   :  { %v1684_v16 = vadd.f32 %v4910_v14, %v1683_v42  ;;  %3945 = vmatprep.mubr.msk.f32.mxu0 %vm980_vm4, %v1752_v9  ;;  %v2125_v9 = vld [vmem:[%s5735_s2 + $0x20] sm:$0xff] }
 0x48e   :  { %3946 = vmatmul.mubr.msk.f32.gmra.mrb[72].mxu0 %vm980_vm4, %v1753_v12  ;;  %v1755_v63 = vmax.f32 %v1689_v40, 0.0 }
 0x48f   :  { %v1754_v13 = vmax.f32 %v1684_v16, 0.0  ;;  %v3889_v17 = vpop.f32.mrb[72].mxu1 }
 0x490   :  { %v1699_v18 = vadd.f32 %v3889_v17, %v4910_v14  ;;  %v1693_v43 = vpop.f32.mrb[73].mxu1 }
 0x491   :  { %v1694_v59 = vadd.f32 %v4910_v14, %v1693_v43  ;;  %3948 = vmatprep.mubr.msk.f32.mxu0 %vm980_vm4, %v1754_v13  ;;  %v2128_v43 = vld [vmem:[%s5735_s2 + $0x38] sm:$0xff] }
 0x492   :  { %3949 = vmatmul.mubr.msk.f32.gmra.mrb[74].mxu0 %vm980_vm4, %v1755_v63  ;;  %v1757_v20 = vmax.f32 %v1699_v18, 0.0 }
 0x493   :  { %v1756_v61 = vmax.f32 %v1694_v59, 0.0  ;;  %v3892_v45 = vpop.f32.mrb[74].mxu1 }
 0x494   :  { %v1709_v44 = vadd.f32 %v3892_v45, %v4910_v14  ;;  %v1703_v46 = vpop.f32.mrb[75].mxu1 }
 0x495   :  { %v1704_v21 = vadd.f32 %v4910_v14, %v1703_v46  ;;  %3951 = vmatprep.mubr.msk.f32.mxu0 %vm980_vm4, %v1756_v61  ;;  %v2127_v46 = vld [vmem:[%s5735_s2 + $0x30] sm:$0xff] }
 0x496   :  { %3952 = vmatmul.mubr.msk.f32.gmra.mrb[76].mxu0 %vm980_vm4, %v1757_v20  ;;  %v1759_v24 = vmax.f32 %v1709_v44, 0.0 }
 0x497   :  { %v1758_v22 = vmax.f32 %v1704_v21, 0.0  ;;  %v3895_v23 = vpop.f32.mrb[76].mxu1 }
 0x498   :  { %v1719_v25 = vadd.f32 %v3895_v23, %v4910_v14  ;;  %v1713_v26 = vpop.f32.mrb[77].mxu1 }
 0x499   :  { %v1714_v0 = vadd.f32 %v4910_v14, %v1713_v26  ;;  %3954 = vmatprep.mubr.msk.f32.mxu0 %vm980_vm4, %v1758_v22 }
 0x49a   :  { %3955 = vmatmul.mubr.msk.f32.gmra.mrb[78].mxu0 %vm980_vm4, %v1759_v24  ;;  %v1761_v47 = vmax.f32 %v1719_v25, 0.0 }
 0x49b   :  { %v1760_v3 = vmax.f32 %v1714_v0, 0.0  ;;  %v3898_v27 = vpop.f32.mrb[78].mxu1 }
 0x49c   :  { %v1729_v48 = vadd.f32 %v3898_v27, %v4910_v14  ;;  %v1723_v50 = vpop.f32.mrb[79].mxu1 }
 0x49d   :  { %v1724_v49 = vadd.f32 %v4910_v14, %v1723_v50  ;;  %3957 = vmatprep.mubr.msk.f32.mxu0 %vm980_vm4, %v1760_v3  ;;  %v2122_v14 = vld [vmem:[%s5735_s2 + $0x8] sm:$0xff] }
 0x49e   :  { %3958 = vmatmul.mubr.msk.f32.gmra.mrb[80].mxu0 %vm980_vm4, %v1761_v47  ;;  %v1763_v29 = vmax.f32 %v1729_v48, 0.0 }
 0x49f   :  { %v1762_v28 = vmax.f32 %v1724_v49, 0.0 }
 0x4a1   :  { %3960 = vmatprep.mubr.msk.f32.mxu0 %vm980_vm4, %v1762_v28 }
 0x4a2   :  { %3961 = vmatmul.mubr.msk.f32.gmra.mrb[82].mxu0 %vm980_vm4, %v1763_v29 }
 0x539   :  { %v3917_v35 = vpop.f32.mrb[52].mxu0 }
 0x53a   :  { %v1936_v31 = vadd.f32 %v3917_v35, %v4979_v30  ;;  %v1930_v37 = vpop.f32.mrb[53].mxu0  ;;  %v2130_v35 = vld [vmem:[%s5735_s2 + $0x48] sm:$0xff] }
 0x53b   :  { %v1931_v32 = vadd.f32 %v4979_v30, %v1930_v37 }
 0x53c   :  { %v2090_v52 = vmax.f32 %v1936_v31, 0.0  ;;  %v2129_v31 = vld [vmem:[%s5735_s2 + $0x40] sm:$0xff] }
 0x53d   :  { %v2089_v7 = vmax.f32 %v1931_v32, 0.0  ;;  %v3920_v11 = vpop.f32.mrb[54].mxu0 }
 0x53e   :  { %v4989_v33 = vadd.f32 %v2122_v14, %v2090_v52  ;;  %v1946_v51 = vadd.f32 %v3920_v11, %v4979_v30  ;;  %v1940_v53 = vpop.f32.mrb[55].mxu0 }
 0x53f   :  { %v4992_v34 = vadd.f32 %v2121_v54, %v2089_v7  ;;  %v1941_v2 = vadd.f32 %v4979_v30, %v1940_v53 }
 0x540   :  { %v2186_v4 = vsel %vm1410_vm5, %v4989_v33, -inf  ;;  %v2092_v5 = vmax.f32 %v1946_v51, 0.0 }
 0x541   :  { %v2185_v38 = vsel %vm1410_vm5, %v4992_v34, -inf  ;;  %v2091_v39 = vmax.f32 %v1941_v2, 0.0  ;;  %v3923_v56 = vpop.f32.mrb[56].mxu0 }
 0x542   :  { %v2187_v6 = vmax.f32 %v2185_v38, %v2186_v4  ;;  %v5005_v58 = vadd.f32 %v2124_v1, %v2092_v5  ;;  %v1956_v41 = vadd.f32 %v3923_v56, %v4979_v30  ;;  %v1950_v55 = vpop.f32.mrb[57].mxu0 }
 0x543   :  { %v5008_v57 = vadd.f32 %v2123_v36, %v2091_v39  ;;  %v1951_v15 = vadd.f32 %v4979_v30, %v1950_v55  ;;  %v5059_v36 = vpop.permute.xlu0 %2617  ;;  %v5066_v55 = vpop.permute.xlu1 %2619 }
 0x544   :  { %v2188_v60 = vrot.slane %v2187_v6, 4  ;;  %v2195_v62 = vsel %vm1410_vm5, %v5005_v58, -inf  ;;  %v2094_v19 = vmax.f32 %v1956_v41, 0.0  ;;  %v2132_v41 = vld [vmem:[%s5735_s2 + $0x58] sm:$0xff] }
 0x545   :  { %v2194_v10 = vsel %vm1410_vm5, %v5008_v57, -inf  ;;  %v2093_v12 = vmax.f32 %v1951_v15, 0.0  ;;  %v3926_v40 = vpop.f32.mrb[58].mxu0 }
 0x546   :  { %v2189_v42 = vmax.f32 %v2187_v6, %v2188_v60  ;;  %v2196_v16 = vmax.f32 %v2194_v10, %v2195_v62  ;;  %v5021_v13 = vadd.f32 %v2126_v8, %v2094_v19  ;;  %v1966_v17 = vadd.f32 %v3926_v40, %v4979_v30  ;;  %v1960_v63 = vpop.f32.mrb[59].mxu0 }
 0x547   :  { %v5024_v18 = vadd.f32 %v2125_v9, %v2093_v12  ;;  %v1961_v59 = vadd.f32 %v4979_v30, %v1960_v63  ;;  %v2131_v63 = vld [vmem:[%s5735_s2 + $0x50] sm:$0xff] }
 0x548   :  { %v2190_v61 = vrot.slane %v2189_v42, 2  ;;  %v2197_v45 = vrot.slane %v2196_v16, 4  ;;  %v2204_v20 = vsel %vm1410_vm5, %v5021_v13, -inf  ;;  %v2096_v44 = vmax.f32 %v1966_v17, 0.0 }
 0x549   :  { %v2203_v21 = vsel %vm1410_vm5, %v5024_v18, -inf  ;;  %v2095_v22 = vmax.f32 %v1961_v59, 0.0  ;;  %v3929_v23 = vpop.f32.mrb[60].mxu0 }
 0x54a   :  { %v2191_v24 = vmax.f32 %v2189_v42, %v2190_v61  ;;  %v2198_v25 = vmax.f32 %v2196_v16, %v2197_v45  ;;  %v2205_v26 = vmax.f32 %v2203_v21, %v2204_v20  ;;  %v5037_v0 = vadd.f32 %v2128_v43, %v2096_v44  ;;  %v1970_v3 = vpop.f32.mrb[61].mxu0  ;;  %v5077_v43 = vpop.permute.xlu0 %2621 }
 0x54b   :  { %v5039_v27 = vadd.f32 %v2127_v46, %v2095_v22  ;;  %v1976_v47 = vadd.f32 %v3929_v23, %v4979_v30  ;;  %v1971_v48 = vadd.f32 %v4979_v30, %v1970_v3 }
 0x54c   :  { %v2192_v50 = vrot.slane %v2191_v24, 1  ;;  %v2199_v49 = vrot.slane %v2198_v25, 2  ;;  %v2206_v28 = vrot.slane %v2205_v26, 4  ;;  %v2213_v29 = vsel %vm1410_vm5, %v5037_v0, -inf }
 0x54d   :  { %v2212_v37 = vsel %vm1410_vm5, %v5039_v27, -inf  ;;  %v2098_v14 = vmax.f32 %v1976_v47, 0.0  ;;  %v2097_v32 = vmax.f32 %v1971_v48, 0.0  ;;  %v3932_v52 = vpop.f32.mrb[62].mxu0 }
 0x54e   :  { %v2193_v54 = vmax.f32 %v2191_v24, %v2192_v50  ;;  %v2200_v7 = vmax.f32 %v2198_v25, %v2199_v49  ;;  %v2207_v11 = vmax.f32 %v2205_v26, %v2206_v28  ;;  %v2214_v51 = vmax.f32 %v2212_v37, %v2213_v29  ;;  %v1980_v53 = vpop.f32.mrb[63].mxu0  ;;  %v5085_v26 = vpop.permute.xlu1 %2623  ;;  %v2134_v37 = vld [vmem:[%s5735_s2 + $0x68] sm:$0xff] }
 0x54f   :  { %v5053_v1 = vadd.f32 %v2130_v35, %v2098_v14  ;;  %v5055_v2 = vadd.f32 %v2129_v31, %v2097_v32  ;;  %v1986_v4 = vadd.f32 %v3932_v52, %v4979_v30  ;;  %v1981_v5 = vadd.f32 %v4979_v30, %v1980_v53  ;;  %v2133_v14 = vld [vmem:[%s5735_s2 + $0x60] sm:$0xff]  ;;  %v5099_v32 = vpop.permute.xlu0 %2625 }
 0x550   :  { %v2329_v38 = vsub.f32 %v4992_v34, %v2193_v54  ;;  %v2330_v39 = vsub.f32 %v4989_v33, %v2193_v54  ;;  %v2201_v56 = vrot.slane %v2200_v7, 1  ;;  %v2208_v6 = vrot.slane %v2207_v11, 2 }
 0x551   :  { %v2215_v8 = vrot.slane %v2214_v51, 4  ;;  %v2222_v15 = vsel %vm1410_vm5, %v5053_v1, -inf  ;;  %v2221_v60 = vsel %vm1410_vm5, %v5055_v2, -inf  ;;  %v2100_v62 = vmax.f32 %v1986_v4, 0.0  ;;  %v3935_v19 = vpop.f32.mrb[64].mxu0 }
 0x552   :  { %v2361_v34 = vmul.f32 1.442695, %v2329_v38  ;;  %v2363_v9 = vmul.f32 1.442695, %v2330_v39  ;;  %v2202_v33 = vmax.f32 %v2200_v7, %v2201_v56  ;;  %v2209_v10 = vmax.f32 %v2207_v11, %v2208_v6  ;;  %v1990_v12 = vpop.f32.mrb[65].mxu0  ;;  %v5101_v7 = vpop.permute.xlu1 %2627 }
 0x553   :  { %v2216_v40 = vmax.f32 %v2214_v51, %v2215_v8  ;;  %v2223_v42 = vmax.f32 %v2221_v60, %v2222_v15  ;;  %v5072_v16 = vadd.f32 %v2132_v41, %v2100_v62  ;;  %v2099_v17 = vmax.f32 %v1981_v5, 0.0  ;;  %v2136_v60 = vld [vmem:[%s5735_s2 + $0x78] sm:$0xff] }
 0x554   :  { %4034 = vpow2.f32 %v2361_v34  ;;  %v2331_v59 = vsub.f32 %v5008_v57, %v2202_v33  ;;  %v2332_v61 = vsub.f32 %v5005_v58, %v2202_v33  ;;  %v2210_v45 = vrot.slane %v2209_v10, 1 }
 0x555   :  { %4036 = vpow2.f32 %v2363_v9  ;;  %v2217_v20 = vrot.slane %v2216_v40, 2  ;;  %v2224_v44 = vrot.slane %v2223_v42, 4  ;;  %v2231_v46 = vsel %vm1410_vm5, %v5072_v16, -inf  ;;  %v3938_v25 = vpop.f32.mrb[66].mxu0 }
 0x556   :  { %v2365_v21 = vmul.f32 1.442695, %v2331_v59  ;;  %v2367_v22 = vmul.f32 1.442695, %v2332_v61  ;;  %v2211_v23 = vmax.f32 %v2209_v10, %v2210_v45  ;;  %v5083_v24 = vadd.f32 %v2131_v63, %v2099_v17  ;;  %v2000_v48 = vpop.f32.mrb[67].mxu0  ;;  %v2135_v17 = vld [vmem:[%s5735_s2 + $0x70] sm:$0xff]  ;;  %v5127_v59 = vpop.permute.xlu0 %2629 }
 0x557   :  { %v2218_v3 = vmax.f32 %v2216_v40, %v2217_v20  ;;  %v2225_v47 = vmax.f32 %v2223_v42, %v2224_v44  ;;  %v1996_v57 = vadd.f32 %v3935_v19, %v4979_v30  ;;  %v1991_v58 = vadd.f32 %v4979_v30, %v1990_v12 }
 0x558   :  { %4038 = vpow2.f32 %v2365_v21  ;;  %v2333_v50 = vsub.f32 %v5024_v18, %v2211_v23  ;;  %v2334_v49 = vsub.f32 %v5021_v13, %v2211_v23  ;;  %v2230_v28 = vsel %vm1410_vm5, %v5083_v24, -inf }
 0x559   :  { %4040 = vpow2.f32 %v2367_v22  ;;  %v2219_v29 = vrot.slane %v2218_v3, 1  ;;  %v2226_v35 = vrot.slane %v2225_v47, 2  ;;  %v2232_v31 = vmax.f32 %v2230_v28, %v2231_v46  ;;  %v3941_v5 = vpop.f32.mrb[68].mxu0  ;;  %v5134_v46 = vpop.permute.xlu1 %2631 }
 0x55a   :  { %v2369_v18 = vmul.f32 1.442695, %v2333_v50  ;;  %v2371_v52 = vmul.f32 1.442695, %v2334_v49  ;;  %v2102_v13 = vmax.f32 %v1996_v57, 0.0  ;;  %v2101_v54 = vmax.f32 %v1991_v58, 0.0 }
 0x55b   :  { %v2220_v11 = vmax.f32 %v2218_v3, %v2219_v29  ;;  %v2227_v51 = vmax.f32 %v2225_v47, %v2226_v35  ;;  %v2233_v53 = vrot.slane %v2232_v31, 4  ;;  %v2006_v4 = vadd.f32 %v3938_v25, %v4979_v30  ;;  %v2010_v6 = vpop.f32.mrb[69].mxu0  ;;  %v2138_v58 = vld [vmem:[%s5735_s2 + $0x88] sm:$0xff] }
 0x55c   :  { %4042 = vpow2.f32 %v2369_v18  ;;  %v5104_v38 = vadd.f32 %v2134_v37, %v2102_v13  ;;  %v5106_v39 = vadd.f32 %v2133_v14, %v2101_v54  ;;  %v2001_v56 = vadd.f32 %v4979_v30, %v2000_v48  ;;  %v2137_v54 = vld [vmem:[%s5735_s2 + $0x80] sm:$0xff] }
 0x55d   :  { %4044 = vpow2.f32 %v2371_v52  ;;  %v2335_v41 = vsub.f32 %v5039_v27, %v2220_v11  ;;  %v2336_v8 = vsub.f32 %v5037_v0, %v2220_v11  ;;  %v2228_v15 = vrot.slane %v2227_v51, 1  ;;  %v3944_v10 = vpop.f32.mrb[70].mxu0  ;;  %v2140_v11 = vld [vmem:[%s5735_s2 + $0x98] sm:$0xff] }
 0x55e   :  { %v5114_v62 = vpop.eup %4034  ;;  %v2234_v19 = vmax.f32 %v2232_v31, %v2233_v53  ;;  %v2240_v34 = vsel %vm1410_vm5, %v5104_v38, -inf  ;;  %v2239_v9 = vsel %vm1410_vm5, %v5106_v39, -inf  ;;  %v2104_v33 = vmax.f32 %v2006_v4, 0.0  ;;  %v2020_v63 = vpop.f32.mrb[71].mxu0 }
 0x55f   :  { %v5120_v12 = vpop.eup %4036  ;;  %v2373_v27 = vmul.f32 1.442695, %v2335_v41  ;;  %v2375_v0 = vmul.f32 1.442695, %v2336_v8  ;;  %v2229_v40 = vmax.f32 %v2227_v51, %v2228_v15  ;;  %v2241_v42 = vmax.f32 %v2239_v9, %v2240_v34  ;;  %2777 = vrot.lane.b32.xlu0 %v5114_v62, %s4155_s11  ;;  %v5167_v53 = vpop.permute.xlu0 %2633 }
 0x560   :  { %v2235_v61 = vrot.slane %v2234_v19, 2  ;;  %v5129_v45 = vadd.f32 %v2136_v60, %v2104_v33  ;;  %v2103_v20 = vmax.f32 %v2001_v56, 0.0  ;;  %v2016_v44 = vadd.f32 %v3941_v5, %v4979_v30  ;;  %2779 = vrot.lane.b32.xlu1 %v5120_v12, %s4155_s11  ;;  %v5171_v8 = vpop.permute.xlu1 %2635 }
 0x561   :  { %4046 = vpow2.f32 %v2373_v27  ;;  %v2337_v21 = vsub.f32 %v5055_v2, %v2229_v40  ;;  %v2338_v22 = vsub.f32 %v5053_v1, %v2229_v40  ;;  %v2242_v23 = vrot.slane %v2241_v42, 4  ;;  %v3947_v48 = vpop.f32.mrb[72].mxu0  ;;  %v2139_v40 = vld [vmem:[%s5735_s2 + $0x90] sm:$0xff] }
 0x562   :  { %v5138_v25 = vpop.eup %4038  ;;  %4048 = vpow2.f32 %v2375_v0  ;;  %v2236_v3 = vmax.f32 %v2234_v19, %v2235_v61  ;;  %v2249_v47 = vsel %vm1410_vm5, %v5129_v45, -inf  ;;  %v5142_v57 = vadd.f32 %v2135_v17, %v2103_v20  ;;  %v2030_v29 = vpop.f32.mrb[73].mxu0 }
 0x563   :  { %v5147_v50 = vpop.eup %4040  ;;  %v2377_v2 = vmul.f32 1.442695, %v2337_v21  ;;  %v2379_v49 = vmul.f32 1.442695, %v2338_v22  ;;  %v2243_v1 = vmax.f32 %v2241_v42, %v2242_v23  ;;  %v2106_v28 = vmax.f32 %v2016_v44, 0.0  ;;  %2781 = vrot.lane.b32.xlu0 %v5138_v25, %s4155_s11 }
 0x564   :  { %v2237_v35 = vrot.slane %v2236_v3, 1  ;;  %v2248_v31 = vsel %vm1410_vm5, %v5142_v57, -inf  ;;  %v2011_v37 = vadd.f32 %v4979_v30, %v2010_v6  ;;  %v2026_v14 = vadd.f32 %v3944_v10, %v4979_v30  ;;  %2783 = vrot.lane.b32.xlu1 %v5147_v50, %s4155_s11 }
 0x565   :  { %4050 = vpow2.f32 %v2377_v2  ;;  %v2244_v18 = vrot.slane %v2243_v1, 2  ;;  %v2250_v52 = vmax.f32 %v2248_v31, %v2249_v47  ;;  %v5157_v13 = vadd.f32 %v2138_v58, %v2106_v28  ;;  %v3950_v6 = vpop.f32.mrb[74].mxu0  ;;  %v2142_v58 = vld [vmem:[%s5735_s2 + $0xa8] sm:$0xff] }
 0x566   :  { %v5165_v51 = vpop.eup %4042  ;;  %4052 = vpow2.f32 %v2379_v49  ;;  %v2238_v4 = vmax.f32 %v2236_v3, %v2237_v35  ;;  %v2105_v5 = vmax.f32 %v2011_v37, 0.0  ;;  %v2108_v56 = vmax.f32 %v2026_v14, 0.0  ;;  %v2040_v9 = vpop.f32.mrb[75].mxu0 }
 0x567   :  { %v5169_v41 = vpop.eup %4044  ;;  %v2245_v15 = vmax.f32 %v2243_v1, %v2244_v18  ;;  %v2251_v60 = vrot.slane %v2250_v52, 4  ;;  %v2258_v19 = vsel %vm1410_vm5, %v5157_v13, -inf  ;;  %v2021_v34 = vadd.f32 %v4979_v30, %v2020_v63  ;;  %2785 = vrot.lane.b32.xlu0 %v5165_v51, %s4155_s11  ;;  %v5203_v49 = vpop.permute.xlu0 %2637 }
 0x568   :  { %v2339_v33 = vsub.f32 %v5083_v24, %v2238_v4  ;;  %v2340_v10 = vsub.f32 %v5072_v16, %v2238_v4  ;;  %v5180_v27 = vadd.f32 %v2137_v54, %v2105_v5  ;;  %v5182_v0 = vadd.f32 %v2140_v11, %v2108_v56  ;;  %2787 = vrot.lane.b32.xlu1 %v5169_v41, %s4155_s11  ;;  %v5209_v37 = vpop.permute.xlu1 %2639  ;;  %v2141_v54 = vld [vmem:[%s5735_s2 + $0xa0] sm:$0xff] }
 0x569   :  { %v2246_v42 = vrot.slane %v2245_v15, 1  ;;  %v2252_v17 = vmax.f32 %v2250_v52, %v2251_v60  ;;  %v2107_v63 = vmax.f32 %v2021_v34, 0.0  ;;  %v2036_v61 = vadd.f32 %v3947_v48, %v4979_v30  ;;  %v3953_v48 = vpop.f32.mrb[76].mxu0 }
 0x56a   :  { %v2381_v20 = vmul.f32 1.442695, %v2339_v33  ;;  %v2383_v24 = vmul.f32 1.442695, %v2340_v10  ;;  %v2257_v16 = vsel %vm1410_vm5, %v5180_v27, -inf  ;;  %v2267_v44 = vsel %vm1410_vm5, %v5182_v0, -inf }
 0x56b   :  { %v5194_v21 = vpop.eup %4046  ;;  %v2247_v22 = vmax.f32 %v2245_v15, %v2246_v42  ;;  %v2253_v23 = vrot.slane %v2252_v17, 2  ;;  %v2259_v3 = vmax.f32 %v2257_v16, %v2258_v19  ;;  %v5196_v47 = vadd.f32 %v2139_v40, %v2107_v63  ;;  %v2050_v31 = vpop.f32.mrb[77].mxu0 }
 0x56c   :  { %v5201_v2 = vpop.eup %4048  ;;  %4054 = vpow2.f32 %v2381_v20  ;;  %v2110_v1 = vmax.f32 %v2036_v61, 0.0  ;;  %v2031_v28 = vadd.f32 %v4979_v30, %v2030_v29  ;;  %v2046_v35 = vadd.f32 %v3950_v6, %v4979_v30  ;;  %2789 = vrot.lane.b32.xlu0 %v5194_v21, %s4155_s11 }
 0x56d   :  { %4056 = vpow2.f32 %v2383_v24  ;;  %v2341_v14 = vsub.f32 %v5106_v39, %v2247_v22  ;;  %v2342_v18 = vsub.f32 %v5104_v38, %v2247_v22  ;;  %v2254_v52 = vmax.f32 %v2252_v17, %v2253_v23  ;;  %2791 = vrot.lane.b32.xlu1 %v5201_v2, %s4155_s11  ;;  %v2144_v39 = vld [vmem:[%s5735_s2 + $0xb8] sm:$0xff]  ;;  %v3956_v38 = vpop.f32.mrb[78].mxu0  ;;  %v5240_v24 = vpop.permute.xlu0 %2641 }
 0x56e   :  { %v2260_v29 = vrot.slane %v2259_v3, 4  ;;  %v2266_v11 = vsel %vm1410_vm5, %v5196_v47, -inf  ;;  %v5220_v4 = vadd.f32 %v2142_v58, %v2110_v1  ;;  %v2109_v5 = vmax.f32 %v2031_v28, 0.0  ;;  %v5227_v34 = vpop.f32.mrb[79].mxu0 }
 0x56f   :  { %v5225_v56 = vpop.eup %4050  ;;  %v2385_v6 = vmul.f32 1.442695, %v2341_v14  ;;  %v2387_v15 = vmul.f32 1.442695, %v2342_v18  ;;  %v2255_v60 = vrot.slane %v2254_v52, 1  ;;  %v2268_v19 = vmax.f32 %v2266_v11, %v2267_v44 }
 0x570   :  { %v5229_v33 = vpop.eup %4052  ;;  %v2261_v10 = vmax.f32 %v2259_v3, %v2260_v29  ;;  %v2276_v40 = vsel %vm1410_vm5, %v5220_v4, -inf  ;;  %v5233_v42 = vadd.f32 %v2141_v54, %v2109_v5  ;;  %v2112_v17 = vmax.f32 %v2046_v35, 0.0  ;;  %2793 = vrot.lane.b32.xlu0 %v5225_v56, %s4155_s11  ;;  %v5248_v3 = vpop.permute.xlu1 %2643  ;;  %v2143_v35 = vld [vmem:[%s5735_s2 + $0xb0] sm:$0xff] }
 0x571   :  { %4058 = vpow2.f32 %v2385_v6  ;;  %v2256_v63 = vmax.f32 %v2254_v52, %v2255_v60  ;;  %v2269_v61 = vrot.slane %v2268_v19, 4  ;;  %v2041_v20 = vadd.f32 %v4979_v30, %v2040_v9  ;;  %2795 = vrot.lane.b32.xlu1 %v5229_v33, %s4155_s11  ;;  %v5246_v23 = vpop.f32.mrb[80].mxu0 }
 0x572   :  { %4060 = vpow2.f32 %v2387_v15  ;;  %v2262_v16 = vrot.slane %v2261_v10, 2  ;;  %v2275_v44 = vsel %vm1410_vm5, %v5233_v42, -inf  ;;  %v5244_v22 = vadd.f32 %v2144_v39, %v2112_v17  ;;  %v5255_v14 = vpop.f32.mrb[81].mxu0 }
 0x573   :  { %v2343_v58 = vsub.f32 %v5142_v57, %v2256_v63  ;;  %v2344_v9 = vsub.f32 %v5129_v45, %v2256_v63  ;;  %v2270_v1 = vmax.f32 %v2268_v19, %v2269_v61  ;;  %v2277_v28 = vmax.f32 %v2275_v44, %v2276_v40  ;;  %v2146_v57 = vld [vmem:[%s5735_s2 + $0xc8] sm:$0xff] }
 0x574   :  { %v2263_v18 = vmax.f32 %v2261_v10, %v2262_v16  ;;  %v2285_v52 = vsel %vm1410_vm5, %v5244_v22, -inf  ;;  %v2111_v54 = vmax.f32 %v2041_v20, 0.0  ;;  %v2056_v29 = vadd.f32 %v3953_v48, %v4979_v30  ;;  %v5277_v16 = vpop.permute.xlu0 %2645 }
 0x575   :  { %v2389_v45 = vmul.f32 1.442695, %v2343_v58  ;;  %v2391_v11 = vmul.f32 1.442695, %v2344_v9  ;;  %v2271_v5 = vrot.slane %v2270_v1, 2  ;;  %v2278_v39 = vrot.slane %v2277_v28, 4 }
 0x576   :  { %v5263_v6 = vpop.eup %4054  ;;  %v2264_v15 = vrot.slane %v2263_v18, 1  ;;  %v5265_v60 = vadd.f32 %v2143_v35, %v2111_v54  ;;  %v2114_v19 = vmax.f32 %v2056_v29, 0.0  ;;  %v2051_v10 = vadd.f32 %v4979_v30, %v2050_v31  ;;  %v5268_v40 = vpop.f32.mrb[82].mxu0  ;;  %5740 = vst [vmem:[#allocation5_spill] sm:$0xff] %v5277_v16  ;;  %v2145_v9 = vld [vmem:[%s5735_s2 + $0xc0] sm:$0xff] }
 0x577   :  { %v5270_v17 = vpop.eup %4056  ;;  %4062 = vpow2.f32 %v2389_v45  ;;  %v2272_v48 = vmax.f32 %v2270_v1, %v2271_v5  ;;  %v2279_v63 = vmax.f32 %v2277_v28, %v2278_v39  ;;  %v2066_v61 = vadd.f32 %v3956_v38, %v4979_v30  ;;  %2797 = vrot.lane.b32.xlu0 %v5263_v6, %s4155_s11  ;;  %v5275_v20 = vpop.f32.mrb[83].mxu0 }
 0x578   :  { %4064 = vpow2.f32 %v2391_v11  ;;  %v2265_v44 = vmax.f32 %v2263_v18, %v2264_v15  ;;  %v2284_v31 = vsel %vm1410_vm5, %v5265_v60, -inf  ;;  %v5281_v58 = vadd.f32 %v2146_v57, %v2114_v19  ;;  %2799 = vrot.lane.b32.xlu1 %v5270_v17, %s4155_s11  ;;  %v5288_v38 = vpop.permute.xlu1 %2647  ;;  %v2148_v18 = vld [vmem:[%s5735_s2 + $0xd8] sm:$0xff] }
 0x579   :  { %5741 = vst [vmem:[#allocation6_spill] sm:$0xff] %v5288_v38  ;;  %v2273_v1 = vrot.slane %v2272_v48, 1  ;;  %v2280_v28 = vrot.slane %v2279_v63, 2  ;;  %v2286_v35 = vmax.f32 %v2284_v31, %v2285_v52  ;;  %v2113_v54 = vmax.f32 %v2051_v10, 0.0 }
 0x57a   :  { %v2345_v29 = vsub.f32 %v5180_v27, %v2265_v44  ;;  %v2346_v57 = vsub.f32 %v5157_v13, %v2265_v44  ;;  %v2294_v45 = vsel %vm1410_vm5, %v5281_v58, -inf  ;;  %v2116_v11 = vmax.f32 %v2066_v61, 0.0  ;;  %v2147_v44 = vld [vmem:[%s5735_s2 + $0xd0] sm:$0xff] }
 0x57b   :  { %v5297_v5 = vpop.eup %4058  ;;  %v2274_v39 = vmax.f32 %v2272_v48, %v2273_v1  ;;  %v2281_v15 = vmax.f32 %v2279_v63, %v2280_v28  ;;  %v2287_v19 = vrot.slane %v2286_v35, 4  ;;  %v5299_v38 = vadd.f32 %v2145_v9, %v2113_v54  ;;  %v5316_v9 = vpop.permute.xlu0 %2649 }
 0x57c   :  { %v5301_v52 = vpop.eup %4060  ;;  %v2393_v10 = vmul.f32 1.442695, %v2345_v29  ;;  %v2395_v31 = vmul.f32 1.442695, %v2346_v57  ;;  %v5303_v16 = vadd.f32 %v2148_v18, %v2116_v11  ;;  %v2061_v13 = vadd.f32 %v4979_v30, %v5227_v34  ;;  %2801 = vrot.lane.b32.xlu0 %v5297_v5, %s4155_s11 }
 0x57d   :  { %v2347_v27 = vsub.f32 %v5196_v47, %v2274_v39  ;;  %v2348_v48 = vsub.f32 %v5182_v0, %v2274_v39  ;;  %v2282_v63 = vrot.slane %v2281_v15, 1  ;;  %v2288_v61 = vmax.f32 %v2286_v35, %v2287_v19  ;;  %2803 = vrot.lane.b32.xlu1 %v5301_v52, %s4155_s11  ;;  %v5322_v0 = vpop.permute.xlu1 %2651 }
 0x57e   :  { %4066 = vpow2.f32 %v2393_v10  ;;  %v2293_v34 = vsel %vm1410_vm5, %v5299_v38, -inf  ;;  %v2303_v47 = vsel %vm1410_vm5, %v5303_v16, -inf  ;;  %v2115_v1 = vmax.f32 %v2061_v13, 0.0 }
 0x57f   :  { %4068 = vpow2.f32 %v2395_v31  ;;  %v2397_v28 = vmul.f32 1.442695, %v2347_v27  ;;  %v2399_v35 = vmul.f32 1.442695, %v2348_v48  ;;  %v2283_v54 = vmax.f32 %v2281_v15, %v2282_v63 }
 0x580   :  { %v2289_v18 = vrot.slane %v2288_v61, 2  ;;  %v2295_v29 = vmax.f32 %v2293_v34, %v2294_v45  ;;  %v5324_v57 = vadd.f32 %v2147_v44, %v2115_v1  ;;  %v2076_v11 = vadd.f32 %v5246_v23, %v4979_v30  ;;  %v2150_v23 = vld [vmem:[%s5735_s2 + $0xe8] sm:$0xff] }
 0x581   :  { %v5328_v39 = vpop.eup %4062  ;;  %4070 = vpow2.f32 %v2397_v28  ;;  %v2349_v19 = vsub.f32 %v5233_v42, %v2283_v54  ;;  %v2350_v10 = vsub.f32 %v5220_v4, %v2283_v54  ;;  %v2071_v31 = vadd.f32 %v4979_v30, %v5255_v14  ;;  %v2149_v14 = vld [vmem:[%s5735_s2 + $0xe0] sm:$0xff] }
 0x582   :  { %v5334_v13 = vpop.eup %4064  ;;  %4072 = vpow2.f32 %v2399_v35  ;;  %v2290_v15 = vmax.f32 %v2288_v61, %v2289_v18  ;;  %v2296_v45 = vrot.slane %v2295_v29, 4  ;;  %v2302_v27 = vsel %vm1410_vm5, %v5324_v57, -inf  ;;  %2805 = vrot.lane.b32.xlu0 %v5328_v39, %s4155_s11  ;;  %v5348_v61 = vpop.permute.xlu0 %2653 }
 0x583   :  { %v2401_v42 = vmul.f32 1.442695, %v2349_v19  ;;  %v2403_v4 = vmul.f32 1.442695, %v2350_v10  ;;  %v2304_v48 = vmax.f32 %v2302_v27, %v2303_v47  ;;  %v2118_v63 = vmax.f32 %v2076_v11, 0.0  ;;  %2807 = vrot.lane.b32.xlu1 %v5334_v13, %s4155_s11  ;;  %v5352_v35 = vpop.permute.xlu1 %2655 }
 0x584   :  { %v2291_v44 = vrot.slane %v2290_v15, 1  ;;  %v2297_v34 = vmax.f32 %v2295_v29, %v2296_v45  ;;  %v2117_v1 = vmax.f32 %v2071_v31, 0.0  ;;  %v2086_v28 = vadd.f32 %v5268_v40, %v4979_v30  ;;  %v2152_v29 = vld [vmem:[%s5735_s2 + $0xf8] sm:$0xff]  ;;  %v2151_v40 = vld [vmem:[%s5735_s2 + $0xf0] sm:$0xff] }
 0x585   :  { %4074 = vpow2.f32 %v2401_v42  ;;  %v2305_v47 = vrot.slane %v2304_v48, 4  ;;  %v5354_v54 = vadd.f32 %v2150_v23, %v2118_v63  ;;  %v2081_v18 = vadd.f32 %v4979_v30, %v5275_v20 }
 0x586   :  { %4076 = vpow2.f32 %v2403_v4  ;;  %v2292_v11 = vmax.f32 %v2290_v15, %v2291_v44  ;;  %v2298_v19 = vrot.slane %v2297_v34, 2  ;;  %v5358_v10 = vadd.f32 %v2149_v14, %v2117_v1 }
 0x587   :  { %v2306_v31 = vmax.f32 %v2304_v48, %v2305_v47  ;;  %v2312_v45 = vsel %vm1410_vm5, %v5354_v54, -inf  ;;  %v2120_v27 = vmax.f32 %v2086_v28, 0.0  ;;  %v2119_v23 = vmax.f32 %v2081_v18, 0.0  ;;  %v5382_v28 = vpop.permute.xlu0 %2657  ;;  %v5388_v18 = vpop.permute.xlu1 %2659 }
 0x588   :  { %v5368_v30 = vpop.eup %4066  ;;  %v2351_v20 = vsub.f32 %v5265_v60, %v2292_v11  ;;  %v2352_v15 = vsub.f32 %v5244_v22, %v2292_v11  ;;  %v2299_v42 = vmax.f32 %v2297_v34, %v2298_v19  ;;  %v2311_v4 = vsel %vm1410_vm5, %v5358_v10, -inf  ;;  %5742 = vst [vmem:[#allocation7_spill] sm:$0xff] %v5382_v28  ;;  %5743 = vst [vmem:[#allocation8_spill] sm:$0xff] %v5388_v18 }
 0x589   :  { %v5374_v63 = vpop.eup %4068  ;;  %v2307_v14 = vrot.slane %v2306_v31, 2  ;;  %v2313_v44 = vmax.f32 %v2311_v4, %v2312_v45  ;;  %v5376_v48 = vadd.f32 %v2152_v29, %v2120_v27  ;;  %v5378_v1 = vadd.f32 %v2151_v40, %v2119_v23  ;;  %2809 = vrot.lane.b32.xlu0 %v5368_v30, %s4155_s11 }
 0x58a   :  { %v2405_v60 = vmul.f32 1.442695, %v2351_v20  ;;  %v2407_v47 = vmul.f32 1.442695, %v2352_v15  ;;  %v2300_v22 = vrot.slane %v2299_v42, 1  ;;  %2811 = vrot.lane.b32.xlu1 %v5374_v63, %s4155_s11 }
 0x58b   :  { %v5386_v34 = vpop.eup %4070  ;;  %v2308_v11 = vmax.f32 %v2306_v31, %v2307_v14  ;;  %v2314_v19 = vrot.slane %v2313_v44, 4  ;;  %v2321_v29 = vsel %vm1410_vm5, %v5376_v48, -inf  ;;  %v2320_v40 = vsel %vm1410_vm5, %v5378_v1, -inf }
 0x58c   :  { %v5394_v45 = vpop.eup %4072  ;;  %4078 = vpow2.f32 %v2405_v60  ;;  %v2301_v27 = vmax.f32 %v2299_v42, %v2300_v22  ;;  %v2322_v23 = vmax.f32 %v2320_v40, %v2321_v29  ;;  %v5408_v29 = vpop.permute.xlu1 %2663 }
 0x58d   :  { %4080 = vpow2.f32 %v2407_v47  ;;  %v2309_v20 = vrot.slane %v2308_v11, 1  ;;  %v2315_v15 = vmax.f32 %v2313_v44, %v2314_v19  ;;  %2813 = vrot.lane.b32.xlu0 %v5386_v34, %s4155_s11  ;;  %v5406_v47 = vpop.permute.xlu0 %2661 }
 0x58e   :  { %v2353_v31 = vsub.f32 %v5299_v38, %v2301_v27  ;;  %v2354_v4 = vsub.f32 %v5281_v58, %v2301_v27  ;;  %v2323_v14 = vrot.slane %v2322_v23, 4  ;;  %2815 = vrot.lane.b32.xlu1 %v5394_v45, %s4155_s11 }
 0x58f   :  { %v5402_v18 = vpop.eup %4074  ;;  %v2310_v28 = vmax.f32 %v2308_v11, %v2309_v20  ;;  %v2316_v60 = vrot.slane %v2315_v15, 2 }
 0x590   :  { %v5404_v42 = vpop.eup %4076  ;;  %v2409_v44 = vmul.f32 1.442695, %v2353_v31  ;;  %v2411_v22 = vmul.f32 1.442695, %v2354_v4  ;;  %v2324_v19 = vmax.f32 %v2322_v23, %v2323_v14  ;;  %v5418_v4 = vmul.f32 %v5270_v17, %v5209_v37 }
 0x591   :  { %v2355_v38 = vsub.f32 %v5324_v57, %v2310_v28  ;;  %v2356_v58 = vsub.f32 %v5303_v16, %v2310_v28  ;;  %v2317_v40 = vmax.f32 %v2315_v15, %v2316_v60  ;;  %2817 = vrot.lane.b32.xlu0 %v5402_v18, %s4155_s11  ;;  %v5422_v16 = vmul.f32 %v5263_v6, %v5203_v49  ;;  %v5434_v60 = vpop.permute.xlu0 %2665  ;;  %v5438_v49 = vpop.permute.xlu1 %2667 }
 0x592   :  { %4082 = vpow2.f32 %v2409_v44  ;;  %v2325_v11 = vrot.slane %v2324_v19, 2  ;;  %2819 = vrot.lane.b32.xlu1 %v5404_v42, %s4155_s11  ;;  %v5426_v57 = vmul.f32 %v5301_v52, %v5248_v3  ;;  %v5430_v15 = vmul.f32 %v5297_v5, %v5240_v24 }
 0x593   :  { %4084 = vpow2.f32 %v2411_v22  ;;  %v2413_v27 = vmul.f32 1.442695, %v2355_v38  ;;  %v2415_v20 = vmul.f32 1.442695, %v2356_v58  ;;  %v2318_v31 = vrot.slane %v2317_v40, 1 }
 0x594   :  { %v2326_v23 = vmax.f32 %v2324_v19, %v2325_v11 }
 0x595   :  { %4086 = vpow2.f32 %v2413_v27  ;;  %v2319_v28 = vmax.f32 %v2317_v40, %v2318_v31  ;;  %v5450_v38 = vpop.permute.xlu0 %2669  ;;  %v5454_v40 = vpop.permute.xlu1 %2671 }
 0x596   :  { %v5432_v14 = vpop.eup %4078  ;;  %4088 = vpow2.f32 %v2415_v20  ;;  %v2327_v37 = vrot.slane %v2326_v23, 1 }
 0x597   :  { %v5436_v17 = vpop.eup %4080  ;;  %v2357_v6 = vsub.f32 %v5358_v10, %v2319_v28  ;;  %v2358_v3 = vsub.f32 %v5354_v54, %v2319_v28  ;;  %2821 = vrot.lane.b32.xlu0 %v5432_v14, %s4155_s11 }
 0x598   :  { %v2328_v52 = vmax.f32 %v2326_v23, %v2327_v37  ;;  %2823 = vrot.lane.b32.xlu1 %v5436_v17, %s4155_s11 }
 0x599   :  { %v2417_v24 = vmul.f32 1.442695, %v2357_v6  ;;  %v2419_v5 = vmul.f32 1.442695, %v2358_v3  ;;  %v5466_v11 = vpop.permute.xlu0 %2673  ;;  %v5470_v27 = vpop.permute.xlu1 %2675 }
 0x59a   :  { %v2359_v44 = vsub.f32 %v5378_v1, %v2328_v52  ;;  %v2360_v22 = vsub.f32 %v5376_v48, %v2328_v52 }
 0x59b   :  { %4090 = vpow2.f32 %v2417_v24  ;;  %v2713_v24 = vmul.f32 %v5114_v62, %v5059_v36  ;;  %v2716_v36 = vmul.f32 %v5147_v50, %v5085_v26 }
 0x59c   :  { %v5448_v19 = vpop.eup %4082  ;;  %4092 = vpow2.f32 %v2419_v5  ;;  %v2421_v54 = vmul.f32 1.442695, %v2359_v44  ;;  %v2423_v10 = vmul.f32 1.442695, %v2360_v22  ;;  %v2714_v5 = vmul.f32 %v5120_v12, %v5066_v55 }
 0x59d   :  { %v5452_v58 = vpop.eup %4084  ;;  %2825 = vrot.lane.b32.xlu0 %v5448_v19, %s4155_s11  ;;  %v2678_v28 = vpop.permute.xlu0 %2677 }
 0x59e   :  { %4094 = vpow2.f32 %v2421_v54  ;;  %2827 = vrot.lane.b32.xlu1 %v5452_v58, %s4155_s11  ;;  %v2680_v6 = vpop.permute.xlu1 %2679 }
 0x59f   :  { %v5460_v48 = vpop.eup %4086  ;;  %4096 = vpow2.f32 %v2423_v10 }
 0x5a0   :  { %v5462_v1 = vpop.eup %4088 }
 0x5a1   :  { %2829 = vrot.lane.b32.xlu0 %v5460_v48, %s4155_s11 }
 0x5a2   :  { %2831 = vrot.lane.b32.xlu1 %v5462_v1, %s4155_s11 }
 0x5a5   :  { %v5472_v20 = vpop.eup %4090 }
 0x5a6   :  { %v5474_v31 = vpop.eup %4092  ;;  %2833 = vrot.lane.b32.xlu0 %v5472_v20, %s4155_s11 }
 0x5a7   :  { %2835 = vrot.lane.b32.xlu1 %v5474_v31, %s4155_s11 }
 0x5a8   :  { %v4095_v23 = vpop.eup %4094 }
 0x5a9   :  { %v4097_v37 = vpop.eup %4096  ;;  %v5480_v3 = vmul.f32 %v4095_v23, %v2678_v28 }
 0x5aa   :  { %2837 = vrot.lane.b32.xlu0 %v4095_v23, %s4155_s11  ;;  %v5483_v52 = vmul.f32 %v4097_v37, %v2680_v6  ;;  %v2715_v6 = vmul.f32 %v5138_v25, %v5077_v43  ;;  %v2718_v25 = vmul.f32 %v5169_v41, %v5101_v7  ;;  %v2720_v7 = vmul.f32 %v5201_v2, %v5134_v46  ;;  %v47_v2 = vld [vmem:[%s5737_s4 + $0xb8] sm:$0xff] }
 0x5ab   :  { %2839 = vrot.lane.b32.xlu1 %v4097_v37, %s4155_s11 }
 0x5ac   :  { %5744 = vst [vmem:[#allocation9_spill] sm:$0xff] %v5483_v52 }
 0x5d1   :  { %v2778_v44 = vpop.permute.xlu0 %2777 }
 0x5d2   :  { %v2780_v22 = vpop.permute.xlu1 %2779  ;;  %v2873_v54 = vsel %vm1410_vm5, %v2713_v24, %v2778_v44 }
 0x5d3   :  { %v2874_v10 = vsel %vm1410_vm5, %v2714_v5, %v2780_v22  ;;  %v2905_v28 = vsel %vm980_vm4, %v2873_v54, 0.0  ;;  %v2717_v22 = vmul.f32 %v5165_v51, %v5099_v32  ;;  %v2719_v51 = vmul.f32 %v5194_v21, %v5127_v59 }
 0x5d4   :  { %v2906_v23 = vsel %vm980_vm4, %v2874_v10, 0.0 }
 0x5d5   :  { %v2907_v37 = vadd.f32 %v2906_v23, %v2905_v28  ;;  %v2782_v62 = vpop.permute.xlu0 %2781 }
 0x5d6   :  { %v2784_v52 = vpop.permute.xlu1 %2783  ;;  %v2875_v55 = vsel %vm1410_vm5, %v2715_v6, %v2782_v62 }
 0x5d7   :  { %v2908_v12 = vrot.slane %v2907_v37, 4  ;;  %v2876_v24 = vsel %vm1410_vm5, %v2716_v36, %v2784_v52  ;;  %v2914_v5 = vsel %vm980_vm4, %v2875_v55, 0.0 }
 0x5d8   :  { %v2915_v44 = vsel %vm980_vm4, %v2876_v24, 0.0 }
 0x5d9   :  { %v2909_v54 = vadd.f32 %v2908_v12, %v2907_v37  ;;  %v2916_v43 = vadd.f32 %v2915_v44, %v2914_v5  ;;  %v2786_v26 = vpop.permute.xlu0 %2785 }
 0x5da   :  { %v2788_v50 = vpop.permute.xlu1 %2787  ;;  %v2877_v10 = vsel %vm1410_vm5, %v2717_v22, %v2786_v26  ;;  %v48_v26 = vld [vmem:[%s5737_s4 + $0xc0] sm:$0xff] }
 0x5db   :  { %v2910_v28 = vrot.slane %v2909_v54, 2  ;;  %v2917_v23 = vrot.slane %v2916_v43, 4  ;;  %v2878_v52 = vsel %vm1410_vm5, %v2718_v25, %v2788_v50  ;;  %v2923_v6 = vsel %vm980_vm4, %v2877_v10, 0.0 }
 0x5dc   :  { %v2924_v36 = vsel %vm980_vm4, %v2878_v52, 0.0  ;;  %v2722_v10 = vmul.f32 %v5229_v33, %v5171_v8 }
 0x5dd   :  { %v2911_v62 = vadd.f32 %v2910_v28, %v2909_v54  ;;  %v2918_v55 = vadd.f32 %v2917_v23, %v2916_v43  ;;  %v2925_v32 = vadd.f32 %v2924_v36, %v2923_v6  ;;  %v2721_v54 = vmul.f32 %v5225_v56, %v5167_v53 }
 0x5de   :  { %v2790_v41 = vpop.permute.xlu0 %2789  ;;  %v4018_v53 = vpack.c.bf16 %v48_v26, %v47_v2 }
 0x5df   :  { %v2912_v37 = vrot.slane %v2911_v62, 1  ;;  %v2919_v12 = vrot.slane %v2918_v55, 2  ;;  %v2926_v24 = vrot.slane %v2925_v32, 4  ;;  %v2792_v5 = vpop.permute.xlu1 %2791  ;;  %v2879_v44 = vsel %vm1410_vm5, %v2719_v51, %v2790_v41 }
 0x5e0   :  { %v2880_v22 = vsel %vm1410_vm5, %v2720_v7, %v2792_v5  ;;  %v2932_v25 = vsel %vm980_vm4, %v2879_v44, 0.0  ;;  %4019 = vmatprep.subr.bf16.mxu1 %v4018_v53 }
 0x5e1   :  { %v5519_v43 = vadd.f32 %v2912_v37, %v2911_v62  ;;  %v2920_v59 = vadd.f32 %v2919_v12, %v2918_v55  ;;  %v2927_v21 = vadd.f32 %v2926_v24, %v2925_v32  ;;  %v2933_v46 = vsel %vm980_vm4, %v2880_v22, 0.0  ;;  %4021 = vmatpush3.bf16.msra.mxu1 %v4018_v53 }
 0x5e2   :  { %v2934_v50 = vadd.f32 %v2933_v46, %v2932_v25  ;;  %v2794_v28 = vpop.permute.xlu0 %2793 }
 0x5e3   :  { %4098 = vrcp.f32 %v5519_v43  ;;  %v2921_v56 = vrot.slane %v2920_v59, 1  ;;  %v2928_v23 = vrot.slane %v2927_v21, 2  ;;  %v2796_v52 = vpop.permute.xlu1 %2795  ;;  %v2881_v6 = vsel %vm1410_vm5, %v2721_v54, %v2794_v28 }
 0x5e4   :  { %v2935_v36 = vrot.slane %v2934_v50, 4  ;;  %v2882_v62 = vsel %vm1410_vm5, %v2722_v10, %v2796_v52  ;;  %v2941_v55 = vsel %vm980_vm4, %v2881_v6, 0.0 }
 0x5e5   :  { %v5534_v32 = vadd.f32 %v2921_v56, %v2920_v59  ;;  %v2929_v51 = vadd.f32 %v2928_v23, %v2927_v21  ;;  %v2942_v8 = vsel %vm980_vm4, %v2882_v62, 0.0 }
 0x5e6   :  { %v2936_v33 = vadd.f32 %v2935_v36, %v2934_v50  ;;  %v2943_v7 = vadd.f32 %v2942_v8, %v2941_v55 }
 0x5e7   :  { %4100 = vrcp.f32 %v5534_v32  ;;  %v2930_v41 = vrot.slane %v2929_v51, 1 }
 0x5e8   :  { %v2937_v37 = vrot.slane %v2936_v33, 2  ;;  %v2944_v12 = vrot.slane %v2943_v7, 4 }
 0x5e9   :  { %v5538_v24 = vadd.f32 %v2930_v41, %v2929_v51  ;;  %v2798_v5 = vpop.permute.xlu0 %2797  ;;  %v5745_v41 = vld [vmem:[#allocation5_spill] sm:$0xff] }
 0x5ea   :  { %v2938_v44 = vadd.f32 %v2937_v37, %v2936_v33  ;;  %v2945_v22 = vadd.f32 %v2944_v12, %v2943_v7  ;;  %v2800_v25 = vpop.permute.xlu1 %2799  ;;  %v2883_v54 = vsel %vm1410_vm5, %v5422_v16, %v2798_v5  ;;  %v5746_v12 = vld [vmem:[#allocation6_spill] sm:$0xff] }
 0x5eb   :  { %4102 = vrcp.f32 %v5538_v24  ;;  %v2884_v59 = vsel %vm1410_vm5, %v5418_v4, %v2800_v25  ;;  %v2950_v21 = vsel %vm980_vm4, %v2883_v54, 0.0 }
 0x5ec   :  { %v2939_v46 = vrot.slane %v2938_v44, 1  ;;  %v2946_v2 = vrot.slane %v2945_v22, 2  ;;  %v2951_v26 = vsel %vm980_vm4, %v2884_v59, 0.0 }
 0x5ed   :  { %v4099_v50 = vpop.eup %4098  ;;  %v2952_v10 = vadd.f32 %v2951_v26, %v2950_v21 }
 0x5ee   :  { %v5547_v28 = vadd.f32 %v2939_v46, %v2938_v44  ;;  %v2947_v53 = vadd.f32 %v2946_v2, %v2945_v22  ;;  %v2802_v56 = vpop.permute.xlu0 %2801  ;;  %3081 = vrot.lane.b32.xlu1 %v4099_v50, %s4156_s26 }
 0x5ef   :  { %v2953_v16 = vrot.slane %v2952_v10, 4  ;;  %v2804_v23 = vpop.permute.xlu1 %2803  ;;  %v2885_v52 = vsel %vm1410_vm5, %v5430_v15, %v2802_v56  ;;  %v2727_v15 = vmul.f32 %v5328_v39, %v5745_v41  ;;  %v2729_v56 = vmul.f32 %v5368_v30, %v5316_v9 }
 0x5f0   :  { %4104 = vrcp.f32 %v5547_v28  ;;  %v2948_v4 = vrot.slane %v2947_v53, 1  ;;  %v2886_v6 = vsel %vm1410_vm5, %v5426_v57, %v2804_v23  ;;  %v2959_v36 = vsel %vm980_vm4, %v2885_v52, 0.0 }
 0x5f1   :  { %v4101_v62 = vpop.eup %4100  ;;  %v2954_v55 = vadd.f32 %v2953_v16, %v2952_v10  ;;  %v2960_v51 = vsel %vm980_vm4, %v2886_v6, 0.0  ;;  %v2728_v57 = vmul.f32 %v5334_v13, %v5746_v12  ;;  %v2730_v16 = vmul.f32 %v5374_v63, %v5322_v0 }
 0x5f2   :  { %v5557_v8 = vadd.f32 %v2948_v4, %v2947_v53  ;;  %v2961_v33 = vadd.f32 %v2960_v51, %v2959_v36  ;;  %3083 = vrot.lane.b32.xlu0 %v4101_v62, %s4156_s26  ;;  %v2731_v30 = vmul.f32 %v5386_v34, %v5348_v61  ;;  %v2732_v63 = vmul.f32 %v5394_v45, %v5352_v35  ;;  %v5747_v34 = vld [vmem:[#allocation7_spill] sm:$0xff] }
 0x5f3   :  { %v2955_v7 = vrot.slane %v2954_v55, 2 }
 0x5f4   :  { %4106 = vrcp.f32 %v5557_v8  ;;  %v2962_v37 = vrot.slane %v2961_v33, 4  ;;  %v2806_v5 = vpop.permute.xlu0 %2805 }
 0x5f5   :  { %v4103_v44 = vpop.eup %4102  ;;  %v2956_v22 = vadd.f32 %v2955_v7, %v2954_v55  ;;  %v2808_v25 = vpop.permute.xlu1 %2807  ;;  %v2887_v54 = vsel %vm1410_vm5, %v2727_v15, %v2806_v5  ;;  %v2733_v5 = vmul.f32 %v5402_v18, %v5747_v34 }
 0x5f6   :  { %v2963_v59 = vadd.f32 %v2962_v37, %v2961_v33  ;;  %v2888_v21 = vsel %vm1410_vm5, %v2728_v57, %v2808_v25  ;;  %v2968_v46 = vsel %vm980_vm4, %v2887_v54, 0.0  ;;  %3085 = vrot.lane.b32.xlu1 %v4103_v44, %s4156_s26  ;;  %v5748_v44 = vld [vmem:[#allocation8_spill] sm:$0xff] }
 0x5f7   :  { %v2957_v39 = vrot.slane %v2956_v22, 1  ;;  %v2969_v2 = vsel %vm980_vm4, %v2888_v21, 0.0 }
 0x5f8   :  { %v2964_v26 = vrot.slane %v2963_v59, 2  ;;  %v2970_v50 = vadd.f32 %v2969_v2, %v2968_v46 }
 0x5f9   :  { %v5570_v10 = vadd.f32 %v2957_v39, %v2956_v22  ;;  %v2734_v22 = vmul.f32 %v5404_v42, %v5748_v44 }
 0x5fa   :  { %v4105_v13 = vpop.eup %4104  ;;  %v2965_v53 = vadd.f32 %v2964_v26, %v2963_v59  ;;  %v2971_v7 = vrot.slane %v2970_v50, 4 }
 0x5fb   :  { %4108 = vrcp.f32 %v5570_v10  ;;  %v2810_v23 = vpop.permute.xlu0 %2809  ;;  %3087 = vrot.lane.b32.xlu0 %v4105_v13, %s4156_s26 }
 0x5fc   :  { %v2966_v52 = vrot.slane %v2965_v53, 1  ;;  %v2812_v4 = vpop.permute.xlu1 %2811  ;;  %v2889_v6 = vsel %vm1410_vm5, %v2729_v56, %v2810_v23  ;;  %v2972_v54 = vadd.f32 %v2971_v7, %v2970_v50  ;;  %v2735_v50 = vmul.f32 %v5432_v14, %v5406_v47  ;;  %v49_v47 = vld [vmem:[%s5737_s4 + $0xc8] sm:$0xff] }
 0x5fd   :  { %v2890_v36 = vsel %vm1410_vm5, %v2730_v16, %v2812_v4  ;;  %v2977_v62 = vsel %vm980_vm4, %v2889_v6, 0.0  ;;  %v2736_v6 = vmul.f32 %v5436_v17, %v5408_v29  ;;  %v50_v29 = vld [vmem:[%s5737_s4 + $0xd0] sm:$0xff] }
 0x5fe   :  { %v4107_v55 = vpop.eup %4106  ;;  %v5581_v51 = vadd.f32 %v2966_v52, %v2965_v53  ;;  %v2978_v9 = vsel %vm980_vm4, %v2890_v36, 0.0  ;;  %v2973_v42 = vrot.slane %v2972_v54, 2 }
 0x5ff   :  { %v2979_v0 = vadd.f32 %v2978_v9, %v2977_v62  ;;  %v2814_v33 = vpop.permute.xlu0 %2813  ;;  %3089 = vrot.lane.b32.xlu0 %v4107_v55, %s4156_s26 }
 0x600   :  { %4110 = vrcp.f32 %v5581_v51  ;;  %v2816_v41 = vpop.permute.xlu1 %2815  ;;  %v2891_v15 = vsel %vm1410_vm5, %v2731_v30, %v2814_v33  ;;  %v2974_v14 = vadd.f32 %v2973_v42, %v2972_v54 }
 0x601   :  { %v2980_v37 = vrot.slane %v2979_v0, 4  ;;  %v2892_v12 = vsel %vm1410_vm5, %v2732_v63, %v2816_v41  ;;  %v2986_v57 = vsel %vm980_vm4, %v2891_v15, 0.0  ;;  %v4022_v41 = vpack.c.bf16 %v50_v29, %v49_v47 }
 0x602   :  { %v2987_v61 = vsel %vm980_vm4, %v2892_v12, 0.0  ;;  %v2975_v44 = vrot.slane %v2974_v14, 1 }
 0x603   :  { %v2981_v35 = vadd.f32 %v2980_v37, %v2979_v0  ;;  %v2988_v45 = vadd.f32 %v2987_v61, %v2986_v57  ;;  %v2818_v25 = vpop.permute.xlu0 %2817  ;;  %v2737_v57 = vmul.f32 %v5448_v19, %v5434_v60  ;;  %4023 = vmatprep.subr.bf16.mxu1 %v4022_v41 }
 0x604   :  { %v2820_v59 = vpop.permute.xlu1 %2819  ;;  %v2893_v21 = vsel %vm1410_vm5, %v2733_v5, %v2818_v25  ;;  %4025 = vmatpush3.bf16.msra.mxu1 %v4022_v41 }
 0x605   :  { %v4109_v46 = vpop.eup %4108  ;;  %v2982_v39 = vrot.slane %v2981_v35, 2  ;;  %v2989_v2 = vrot.slane %v2988_v45, 4  ;;  %v2894_v26 = vsel %vm1410_vm5, %v2734_v22, %v2820_v59  ;;  %v2995_v13 = vsel %vm980_vm4, %v2893_v21, 0.0 }
 0x606   :  { %v2996_v53 = vsel %vm980_vm4, %v2894_v26, 0.0  ;;  %3091 = vrot.lane.b32.xlu1 %v4109_v46, %s4156_s26  ;;  %v2739_v46 = vmul.f32 %v5460_v48, %v5450_v38 }
 0x607   :  { %v2983_v18 = vadd.f32 %v2982_v39, %v2981_v35  ;;  %v2990_v56 = vadd.f32 %v2989_v2, %v2988_v45  ;;  %v2997_v16 = vadd.f32 %v2996_v53, %v2995_v13  ;;  %v2738_v35 = vmul.f32 %v5452_v58, %v5438_v49 }
 0x608   :  { %v2740_v2 = vmul.f32 %v5462_v1, %v5454_v40  ;;  %v5638_v13 = vadd.f32 %v2975_v44, %v2974_v14  ;;  %v2741_v1 = vmul.f32 %v5472_v20, %v5466_v11 }
 0x609   :  { %v2984_v23 = vrot.slane %v2983_v18, 1  ;;  %v2991_v52 = vrot.slane %v2990_v56, 2  ;;  %v2998_v4 = vrot.slane %v2997_v16, 4  ;;  %v2822_v36 = vpop.permute.xlu0 %2821 }
 0x60a   :  { %v4111_v62 = vpop.eup %4110  ;;  %v2824_v55 = vpop.permute.xlu1 %2823  ;;  %v2895_v9 = vsel %vm1410_vm5, %v2735_v50, %v2822_v36 }
 0x60b   :  { %v5608_v30 = vadd.f32 %v2984_v23, %v2983_v18  ;;  %v2992_v0 = vadd.f32 %v2991_v52, %v2990_v56  ;;  %v2999_v63 = vadd.f32 %v2998_v4, %v2997_v16  ;;  %v2896_v33 = vsel %vm1410_vm5, %v2736_v6, %v2824_v55  ;;  %3093 = vrot.lane.b32.xlu1 %v4111_v62, %s4156_s26 }
 0x60c   :  { %v3005_v17 = vsel %vm980_vm4, %v2896_v33, 0.0  ;;  %v3004_v7 = vsel %vm980_vm4, %v2895_v9, 0.0  ;;  %v2742_v4 = vmul.f32 %v5474_v31, %v5470_v27 }
 0x60d   :  { %4112 = vrcp.f32 %v5608_v30  ;;  %v2993_v15 = vrot.slane %v2992_v0, 1  ;;  %v3000_v37 = vrot.slane %v2999_v63, 2  ;;  %v3006_v12 = vadd.f32 %v3005_v17, %v3004_v7 }
 0x60f   :  { %v5623_v61 = vadd.f32 %v2993_v15, %v2992_v0  ;;  %v3001_v34 = vadd.f32 %v3000_v37, %v2999_v63  ;;  %v3007_v5 = vrot.slane %v3006_v12, 4  ;;  %v2826_v45 = vpop.permute.xlu0 %2825  ;;  %v5749_v37 = vld [vmem:[#allocation9_spill] sm:$0xff] }
 0x610   :  { %v2828_v22 = vpop.permute.xlu1 %2827  ;;  %v2897_v25 = vsel %vm1410_vm5, %v2737_v57, %v2826_v45 }
 0x611   :  { %4114 = vrcp.f32 %v5623_v61  ;;  %v3002_v54 = vrot.slane %v3001_v34, 1  ;;  %v3008_v59 = vadd.f32 %v3007_v5, %v3006_v12  ;;  %v2898_v60 = vsel %vm1410_vm5, %v2738_v35, %v2828_v22 }
 0x612   :  { %v3014_v19 = vsel %vm980_vm4, %v2898_v60, 0.0  ;;  %v3013_v21 = vsel %vm980_vm4, %v2897_v25, 0.0 }
 0x613   :  { %v5634_v49 = vadd.f32 %v3002_v54, %v3001_v34  ;;  %v3009_v58 = vrot.slane %v3008_v59, 2  ;;  %v3015_v39 = vadd.f32 %v3014_v19, %v3013_v21  ;;  %v2830_v26 = vpop.permute.xlu0 %2829 }
 0x614   :  { %v2832_v53 = vpop.permute.xlu1 %2831  ;;  %v2899_v18 = vsel %vm1410_vm5, %v2739_v46, %v2830_v26 }
 0x615   :  { %4116 = vrcp.f32 %v5634_v49  ;;  %v3010_v56 = vadd.f32 %v3009_v58, %v3008_v59  ;;  %v3016_v16 = vrot.slane %v3015_v39, 4  ;;  %v2900_v42 = vsel %vm1410_vm5, %v2740_v2, %v2832_v53 }
 0x616   :  { %v3023_v38 = vsel %vm980_vm4, %v2900_v42, 0.0  ;;  %v3022_v48 = vsel %vm980_vm4, %v2899_v18, 0.0  ;;  %4118 = vrcp.f32 %v5638_v13 }
 0x617   :  { %v4113_v50 = vpop.eup %4112  ;;  %v3011_v23 = vrot.slane %v3010_v56, 1  ;;  %v3017_v52 = vadd.f32 %v3016_v16, %v3015_v39  ;;  %v3024_v40 = vadd.f32 %v3023_v38, %v3022_v48 }
 0x618   :  { %v2834_v6 = vpop.permute.xlu0 %2833  ;;  %3097 = vrot.lane.b32.xlu1 %v4113_v50, %s4156_s26 }
 0x619   :  { %v5651_v36 = vadd.f32 %v3011_v23, %v3010_v56  ;;  %v3018_v62 = vrot.slane %v3017_v52, 2  ;;  %v3025_v55 = vrot.slane %v3024_v40, 4  ;;  %v2836_v9 = vpop.permute.xlu1 %2835  ;;  %v2901_v0 = vsel %vm1410_vm5, %v2741_v1, %v2834_v6 }
 0x61a   :  { %v2902_v63 = vsel %vm1410_vm5, %v2742_v4, %v2836_v9  ;;  %v3031_v33 = vsel %vm980_vm4, %v2901_v0, 0.0 }
 0x61b   :  { %v4115_v11 = vpop.eup %4114  ;;  %4120 = vrcp.f32 %v5651_v36  ;;  %v3019_v20 = vadd.f32 %v3018_v62, %v3017_v52  ;;  %v3026_v47 = vadd.f32 %v3025_v55, %v3024_v40  ;;  %v3032_v27 = vsel %vm980_vm4, %v2902_v63, 0.0 }
 0x61c   :  { %v3033_v31 = vadd.f32 %v3032_v27, %v3031_v33  ;;  %v2838_v29 = vpop.permute.xlu0 %2837  ;;  %3099 = vrot.lane.b32.xlu0 %v4115_v11, %s4156_s26 }
 0x61d   :  { %v3020_v14 = vrot.slane %v3019_v20, 1  ;;  %v3027_v17 = vrot.slane %v3026_v47, 2  ;;  %v2840_v7 = vpop.permute.xlu1 %2839  ;;  %v2903_v41 = vsel %vm1410_vm5, %v5480_v3, %v2838_v29 }
 0x61e   :  { %v3034_v15 = vrot.slane %v3033_v31, 4  ;;  %v2904_v12 = vsel %vm1410_vm5, %v5749_v37, %v2840_v7  ;;  %v3040_v57 = vsel %vm980_vm4, %v2903_v41, 0.0 }
 0x61f   :  { %v4117_v34 = vpop.eup %4116  ;;  %v5664_v5 = vadd.f32 %v3020_v14, %v3019_v20  ;;  %v3028_v35 = vadd.f32 %v3027_v17, %v3026_v47  ;;  %v3041_v45 = vsel %vm980_vm4, %v2904_v12, 0.0 }
 0x620   :  { %v3035_v44 = vadd.f32 %v3034_v15, %v3033_v31  ;;  %v3042_v22 = vadd.f32 %v3041_v45, %v3040_v57  ;;  %3101 = vrot.lane.b32.xlu1 %v4117_v34, %s4156_s26  ;;  %v4119_v3 = vpop.eup %4118 }
 0x621   :  { %4122 = vrcp.f32 %v5664_v5  ;;  %v3029_v25 = vrot.slane %v3028_v35, 1 }
 0x622   :  { %v3036_v54 = vrot.slane %v3035_v44, 2  ;;  %v3043_v59 = vrot.slane %v3042_v22, 4 }
 0x623   :  { %v5669_v60 = vadd.f32 %v3029_v25, %v3028_v35 }
 0x624   :  { %v3037_v19 = vadd.f32 %v3036_v54, %v3035_v44  ;;  %v3044_v21 = vadd.f32 %v3043_v59, %v3042_v22  ;;  %3095 = vrot.lane.b32.xlu1 %v4119_v3, %s4156_s26 }
 0x625   :  { %v4121_v46 = vpop.eup %4120  ;;  %4124 = vrcp.f32 %v5669_v60 }
 0x626   :  { %v3038_v58 = vrot.slane %v3037_v19, 1  ;;  %v3045_v39 = vrot.slane %v3044_v21, 2  ;;  %3103 = vrot.lane.b32.xlu0 %v4121_v46, %s4156_s26 }
 0x628   :  { %v5674_v2 = vadd.f32 %v3038_v58, %v3037_v19  ;;  %v3046_v26 = vadd.f32 %v3045_v39, %v3044_v21 }
 0x62a   :  { %4126 = vrcp.f32 %v5674_v2  ;;  %v3047_v53 = vrot.slane %v3046_v26, 1 }
 0x62b   :  { %v4123_v18 = vpop.eup %4122 }
 0x62c   :  { %v5677_v56 = vadd.f32 %v3047_v53, %v3046_v26  ;;  %3105 = vrot.lane.b32.xlu0 %v4123_v18, %s4156_s26 }
 0x62e   :  { %4128 = vrcp.f32 %v5677_v56 }
 0x62f   :  { %v4125_v16 = vpop.eup %4124 }
 0x630   :  { %3107 = vrot.lane.b32.xlu0 %v4125_v16, %s4156_s26  ;;  %v3469_v16 = vld [vmem:[%s5738_s5 + $0x5] ss:$0 sm:$0xff] }
 0x634   :  { %v4127_v42 = vpop.eup %4126 }
 0x635   :  { %3109 = vrot.lane.b32.xlu0 %v4127_v42, %s4156_s26 }
 0x638   :  { %v4129_v38 = vpop.eup %4128 }
 0x639   :  { %3111 = vrot.lane.b32.xlu1 %v4129_v38, %s4156_s26 }
 0x660   :  { %v3082_v48 = vpop.permute.xlu1 %3081 }
 0x661   :  { %v3129_v27 = vmul.f32 %v3082_v48, %v5519_v43 }
 0x664   :  { %v3084_v23 = vpop.permute.xlu0 %3083 }
 0x665   :  { %v3130_v4 = vmul.f32 %v3084_v23, %v5534_v32 }
 0x667   :  { %v3165_v63 = vrot.slane %v3130_v4, 7 }
 0x668   :  { %v3086_v50 = vpop.permute.xlu1 %3085 }
 0x669   :  { %v3131_v62 = vmul.f32 %v3086_v50, %v5538_v24  ;;  %v3167_v29 = vsel %vm3166_vm6, %v3165_v63, %v3129_v27 }
 0x66b   :  { %v3168_v11 = vrot.slane %v3131_v62, 6 }
 0x66d   :  { %v3088_v40 = vpop.permute.xlu0 %3087 }
 0x66e   :  { %v3132_v9 = vmul.f32 %v3088_v40, %v5547_v28 }
 0x670   :  { %v3171_v32 = vrot.slane %v3132_v9, 5 }
 0x671   :  { %v3090_v6 = vpop.permute.xlu0 %3089 }
 0x672   :  { %v3133_v0 = vmul.f32 %v3090_v6, %v5557_v8  ;;  %v3170_v8 = vsel %vm3169_vm7, %v3168_v11, %v3167_v29 }
 0x673   :  { %v3173_v17 = vsel %vm3172_vm8, %v3171_v32, %v3170_v8 }
 0x674   :  { %v3174_v31 = vrot.slane %v3133_v0, 4 }
 0x676   :  { %v3176_v43 = vsel %vm3175_vm9, %v3174_v31, %v3173_v17 }
 0x678   :  { %v3092_v52 = vpop.permute.xlu1 %3091 }
 0x679   :  { %v3134_v33 = vmul.f32 %v3092_v52, %v5570_v10 }
 0x67b   :  { %v3177_v28 = vrot.slane %v3134_v33, 3 }
 0x67d   :  { %v3094_v1 = vpop.permute.xlu1 %3093  ;;  %v3179_v41 = vsel %vm3178_vm10, %v3177_v28, %v3176_v43 }
 0x67e   :  { %v3135_v20 = vmul.f32 %v3094_v1, %v5581_v51 }
 0x680   :  { %v3180_v10 = vrot.slane %v3135_v20, 2 }
 0x682   :  { %v3182_v37 = vsel %vm3181_vm11, %v3180_v10, %v3179_v41 }
 0x68a   :  { %v3098_v55 = vpop.permute.xlu1 %3097 }
 0x68b   :  { %v3137_v59 = vmul.f32 %v3098_v55, %v5608_v30 }
 0x68e   :  { %v3100_v24 = vpop.permute.xlu0 %3099 }
 0x68f   :  { %v3138_v34 = vmul.f32 %v3100_v24, %v5623_v61 }
 0x691   :  { %v3186_v22 = vrot.slane %v3138_v34, 7 }
 0x692   :  { %v3102_v47 = vpop.permute.xlu1 %3101 }
 0x693   :  { %v3139_v45 = vmul.f32 %v3102_v47, %v5634_v49  ;;  %v3187_v61 = vsel %vm3166_vm6, %v3186_v22, %v3137_v59 }
 0x695   :  { %v3188_v3 = vrot.slane %v3139_v45, 6 }
 0x696   :  { %v3096_v14 = vpop.permute.xlu1 %3095 }
 0x697   :  { %v3136_v51 = vmul.f32 %v3096_v14, %v5638_v13  ;;  %v3189_v49 = vsel %vm3169_vm7, %v3188_v3, %v3187_v61 }
 0x698   :  { %v3104_v7 = vpop.permute.xlu0 %3103 }
 0x699   :  { %v3183_v15 = vrot.slane %v3136_v51, 1  ;;  %v3140_v13 = vmul.f32 %v3104_v7, %v5651_v36 }
 0x69b   :  { %v3185_v12 = vsel %vm3184_vm12, %v3183_v15, %v3182_v37  ;;  %v3190_v19 = vrot.slane %v3140_v13, 5 }
 0x69c   :  { %3971 = vmatprep.mubr.msk.f32.mxu1 %vm1410_vm5, %v3185_v12 }
 0x69e   :  { %v3106_v57 = vpop.permute.xlu0 %3105 }
 0x69f   :  { %v3141_v44 = vmul.f32 %v3106_v57, %v5664_v5  ;;  %v3191_v5 = vsel %vm3172_vm8, %v3190_v19, %v3189_v49 }
 0x6a1   :  { %v3192_v46 = vrot.slane %v3141_v44, 4 }
 0x6a2   :  { %v3108_v35 = vpop.permute.xlu0 %3107 }
 0x6a3   :  { %v3142_v25 = vmul.f32 %v3108_v35, %v5669_v60  ;;  %v3193_v60 = vsel %vm3175_vm9, %v3192_v46, %v3191_v5 }
 0x6a5   :  { %v3194_v58 = vrot.slane %v3142_v25, 3 }
 0x6a7   :  { %v3110_v54 = vpop.permute.xlu0 %3109  ;;  %v3195_v53 = vsel %vm3178_vm10, %v3194_v58, %v3193_v60 }
 0x6a8   :  { %v3143_v21 = vmul.f32 %v3110_v54, %v5674_v2 }
 0x6aa   :  { %v3196_v39 = vrot.slane %v3143_v21, 2 }
 0x6ab   :  { %v3112_v36 = vpop.permute.xlu1 %3111 }
 0x6ac   :  { %v3144_v26 = vmul.f32 %v3112_v36, %v5677_v56  ;;  %v3197_v18 = vsel %vm3181_vm11, %v3196_v39, %v3195_v53 }
 0x6ae   :  { %v3198_v30 = vrot.slane %v3144_v26, 1 }
 0x6b0   :  { %v3199_v2 = vsel %vm3184_vm12, %v3198_v30, %v3197_v18 }
 0x6b1   :  { %3972 = vmatmul.mubr.msk.f32.vlgmr.msra.gmra.mrb[80].mxu1 %vm1410_vm5, %v3199_v2 }
 0x784   :  { %v3973_v42 = vpop.f32.mrb[80].mxu1 }
 0x785   :  { %v3276_v38 = vadd.f32 %v3973_v42, %v3469_v16  ;;  %v3270_v48 = vpop.f32.mrb[81].mxu1 }
 0x786   :  { %v3271_v56 = vadd.f32 %v3469_v16, %v3270_v48 }
 0x787   :  { %v3280_v50 = vmax.f32 %v3276_v38, 0.0 }
 0x788   :  { %v3279_v23 = vmax.f32 %v3271_v56, 0.0 }
 0x789   :  { %3282 = vst.msk [vmem:[#allocation2 + $0x8] sm:$0xff] %vm1410_vm5, %v3280_v50 }
 0x78a   :  { %3281 = vst.msk [vmem:[#allocation2] sm:$0xff] %vm1410_vm5, %v3279_v23 }
 0x78b   :  { %4141 = shalt.err (!%p4138_p4)
}
 0x78c   :  { %s4142_s30 = scalar_lea.hbm %s5739_s6, 256 }
 0x78d   :  { %p4143_p5 = scmp.ne.s32.totalorder %s5739_s6, %s4142_s30  ;;  %p4146_p6 = scmp.lt.u32.totalorder %s4142_s30, %s5739_s6 }
 0x78f   :  { %p4148_p7 = pnand %p4146_p6, %p4143_p5 }
 0x791   :  { %4151 = shalt.err (!%p4148_p7)
}
 0x792   :  { %s4158_s10 = smov 128   ;;  %s4159_s12 = smov 8  }
 0x793   :  { %3294 = dma.vmem_to_hbm [thread:$0]  %s3289_s27, 256, %s5739_s6, [#allocation3], %s4158_s10, %s4158_s10, %s4159_s12  }
 0x794   :  { %4152 = dma.done.wait [#allocation3], 256  }
 0x795   :  { %4153 = vsyncadd [#allocation3], 4294967040 }
 0x796   :  { %3298 = vsyncpa [#allocation3], 1 }

</bundles_post_ra>
